<compile_context>
chip_gen: v6e
topology: v6e:2x2x1
jax: 0.10.0
libtpu: 0.0.40
codegen_flags: <defaults>
</compile_context>

<pallas_src>
import math
from functools import partial

import jax
import jax.numpy as jnp
from jax.experimental import pallas as pl
from jax.experimental.pallas import tpu as pltpu

# ---- tiling policy -------------------------------------------------------
TM_MAX = 1024                       # rows per MXU tile (adapted down for small M)
WEIGHT_VMEM_BUDGET = 12 * 1024 * 1024   # double-buffered bf16 weight panel budget
VMEM_LIMIT = 48 * 1024 * 1024       # < v7x 64 MiB physical VMEM


def _round_up(x, m):
    return (x + m - 1) // m * m


def _pick_tn(np_, kp, budget):
    """Largest 128-multiple divisor of np_ covering N in >=2 steps within budget."""
    target = max(np_ // 2, 128)
    best = 128
    for d in range(128, np_ + 1, 128):
        if np_ % d == 0 and d <= target and 2 * kp * d * 2 <= budget:
            best = d
    return best


def _choose_tk(kp, tn, budget):
    """Largest 128-multiple divisor of kp whose double-buffered panel fits."""
    units = kp // 128
    for d in range(units, 0, -1):
        if units % d == 0 and 2 * (d * 128) * tn * 2 <= budget:
            return d * 128
    return 128


def _select_tiles(m, kp, np_):
    tm = min(_round_up(m, 16), TM_MAX)
    mp = _round_up(m, tm)
    tn = _pick_tn(np_, kp, WEIGHT_VMEM_BUDGET)
    if 2 * kp * tn * 2 <= WEIGHT_VMEM_BUDGET:
        tk = kp                      # single K grid step
    else:
        tk = _choose_tk(kp, tn, WEIGHT_VMEM_BUDGET)
    # keep >=2 parallel grid iterations for dual-TensorCore chips when cheap
    if mp // tm == 1 and np_ // tn == 1 and tm >= 32 and tm % 32 == 0:
        tm //= 2
    return tm, mp, tn, tk


def _maybe_pad(x, rows, cols):
    r, c = x.shape
    if r == rows and c == cols:
        return x
    return jnp.pad(x, ((0, rows - r), (0, cols - c)))


# --------------------------------------------------------------------------
# Pallas kernels
# --------------------------------------------------------------------------
def _mm_single_kernel(*refs, num_a, tap_k, relu, has_res):
    """Single K-step: out = maybe_relu(sum_t dot(a_t, w_t) * s + t [+ res])."""
    a_refs = refs[:num_a]
    b_ref = refs[num_a]
    s_ref = refs[num_a + 1]
    t_ref = refs[num_a + 2]
    if has_res:
        r_ref = refs[num_a + 3]
        o_ref = refs[num_a + 4]
    else:
        r_ref = None
        o_ref = refs[num_a + 3]

    if num_a == 1:
        acc = jnp.dot(a_refs[0][...], b_ref[...],
                      preferred_element_type=jnp.float32)
    else:
        acc = jnp.dot(a_refs[0][...], b_ref[0:tap_k, :],
                      preferred_element_type=jnp.float32)
        for t in range(1, num_a):
            acc = acc + jnp.dot(a_refs[t][...],
                                b_ref[t * tap_k:(t + 1) * tap_k, :],
                                preferred_element_type=jnp.float32)
    y = acc * s_ref[...] + t_ref[...]
    if has_res:
        y = y + r_ref[...].astype(jnp.float32)
    if relu:
        y = jnp.maximum(y, 0.0)
    o_ref[...] = y.astype(o_ref.dtype)


def _mm_multi_kernel(a_ref, b_ref, s_ref, t_ref, *refs, relu, has_res):
    """Generic K-tiled fallback: acc += a@b; last step applies the epilogue."""
    if has_res:
        r_ref, o_ref, acc_ref = refs
    else:
        o_ref, acc_ref = refs
        r_ref = None

    @pl.when(pl.program_id(2) == 0)
    def _():
        acc_ref[...] = jnp.zeros_like(acc_ref)

    acc_ref[...] += jnp.dot(a_ref[...], b_ref[...],
                            preferred_element_type=jnp.float32)

    @pl.when(pl.program_id(2) == pl.num_programs(2) - 1)
    def _():
        y = acc_ref[...] * s_ref[...] + t_ref[...]
        if has_res:
            y = y + r_ref[...].astype(jnp.float32)
        if relu:
            y = jnp.maximum(y, 0.0)
        o_ref[...] = y.astype(o_ref.dtype)


@partial(jax.jit, static_argnames=("relu",))
def matmul_affine(a_list, b_p, s_p, t_p, residual, *, relu):
    """out = maybe_relu((sum_t a_t @ w_t) * scale + bias [+ residual]), padded.

    a_list: list of (M, Ka) bf16 activations (1 entry for 1x1/stem, 9 taps for
            3x3).  b_p: (Kp, Np) bf16 pre-padded weight.  s_p/t_p: (1, Np) f32.
    residual: (M, Np) bf16 or None.  Returns padded (Mp, Np) bf16.
    """
    num_a = len(a_list)
    M, Ka = a_list[0].shape
    Kp, Np = b_p.shape
    TM, Mp, TN, TK = _select_tiles(M, Kp, Np)
    single_k = (TK == Kp)
    has_res = residual is not None

    if not single_k and num_a > 1:
        # fallback: K must be tiled -> concatenate taps into one patch matrix
        a_list = [jnp.concatenate(a_list, axis=-1)]
        num_a = 1
        Ka = a_list[0].shape[1]

    ka_p = Kp if num_a == 1 else Ka
    a_padded = [_maybe_pad(a, Mp, ka_p) for a in a_list]

    inputs = list(a_padded) + [b_p, s_p, t_p]
    if has_res:
        inputs.append(_maybe_pad(residual, Mp, Np))

    if single_k:
        grid = (Mp // TM, Np // TN)
        in_specs = ([pl.BlockSpec((TM, ka_p), lambda i, j: (i, 0))] * num_a
                    + [pl.BlockSpec((Kp, TN), lambda i, j: (0, j)),
                       pl.BlockSpec((1, TN), lambda i, j: (0, j)),
                       pl.BlockSpec((1, TN), lambda i, j: (0, j))])
        if has_res:
            in_specs.append(pl.BlockSpec((TM, TN), lambda i, j: (i, j)))
        out = pl.pallas_call(
            partial(_mm_single_kernel, num_a=num_a, tap_k=ka_p,
                    relu=relu, has_res=has_res),
            out_shape=jax.ShapeDtypeStruct((Mp, Np), jnp.bfloat16),
            grid_spec=pltpu.PrefetchScalarGridSpec(
                num_scalar_prefetch=0,
                grid=grid,
                in_specs=in_specs,
                out_specs=pl.BlockSpec((TM, TN), lambda i, j: (i, j)),
            ),
            compiler_params=pltpu.CompilerParams(
                dimension_semantics=("parallel", "parallel"),
                vmem_limit_bytes=VMEM_LIMIT,
            ),
        )(*inputs)
    else:
        grid = (Mp // TM, Np // TN, Kp // TK)
        in_specs = [
            pl.BlockSpec((TM, TK), lambda i, j, k: (i, k)),
            pl.BlockSpec((TK, TN), lambda i, j, k: (k, j)),
            pl.BlockSpec((1, TN), lambda i, j, k: (0, j)),
            pl.BlockSpec((1, TN), lambda i, j, k: (0, j)),
        ]
        if has_res:
            in_specs.append(pl.BlockSpec((TM, TN), lambda i, j, k: (i, j)))
        out = pl.pallas_call(
            partial(_mm_multi_kernel, relu=relu, has_res=has_res),
            out_shape=jax.ShapeDtypeStruct((Mp, Np), jnp.bfloat16),
            grid_spec=pltpu.PrefetchScalarGridSpec(
                num_scalar_prefetch=0,
                grid=grid,
                in_specs=in_specs,
                out_specs=pl.BlockSpec((TM, TN), lambda i, j, k: (i, j)),
                scratch_shapes=[pltpu.VMEM((TM, TN), jnp.float32)],
            ),
            compiler_params=pltpu.CompilerParams(
                dimension_semantics=("parallel", "parallel", "arbitrary"),
                vmem_limit_bytes=VMEM_LIMIT,
            ),
        )(*inputs)
    return out


def _max9_kernel(*refs):
    o_ref = refs[9]
    m = refs[0][...]
    for i in range(1, 9):
        m = jnp.maximum(m, refs[i][...])
    o_ref[...] = m


@jax.jit
def _max9(slices):
    rows, C = slices[0].shape
    br = rows
    for cand in (256, 128, 64, 32, 16, 8):
        if rows % cand == 0:
            br = cand
            break
    return pl.pallas_call(
        _max9_kernel,
        out_shape=jax.ShapeDtypeStruct((rows, C), slices[0].dtype),
        grid_spec=pltpu.PrefetchScalarGridSpec(
            num_scalar_prefetch=0,
            grid=(rows // br,),
            in_specs=[pl.BlockSpec((br, C), lambda i: (i, 0))] * 9,
            out_specs=pl.BlockSpec((br, C), lambda i: (i, 0)),
        ),
        compiler_params=pltpu.CompilerParams(
            dimension_semantics=("parallel",),
            vmem_limit_bytes=VMEM_LIMIT,
        ),
    )(*slices)


# --------------------------------------------------------------------------
# Plain-JAX glue: tap extraction, maxpool window extraction
# --------------------------------------------------------------------------
def conv_taps(x, kh, kw, stride, pad):
    """x: (N,H,W,C) NHWC -> list of kh*kw shifted strided views, each (N*Ho*Wo, C)."""
    N, H, W, C = x.shape
    xp = jnp.pad(x, ((0, 0), (pad, pad), (pad, pad), (0, 0)))
    Ho = (H + 2 * pad - kh) // stride + 1
    Wo = (W + 2 * pad - kw) // stride + 1
    taps = []
    for dh in range(kh):
        for dw in range(kw):
            sl = jax.lax.slice(
                xp,
                (0, dh, dw, 0),
                (N, dh + (Ho - 1) * stride + 1, dw + (Wo - 1) * stride + 1, C),
                (1, stride, stride, 1),
            )
            taps.append(sl.reshape(N * Ho * Wo, C))
    return taps, (N, Ho, Wo)


def maxpool_3x3_s2_p1(x):
    """x: (N,H,W,C) bf16 (C multiple of 128) -> (N,Ho,Wo,C); k=3, s=2, p=1."""
    N, H, W, C = x.shape
    s, k, pad = 2, 3, 1
    Ho = (H + 2 * pad - k) // s + 1
    Wo = (W + 2 * pad - k) // s + 1
    xp = jnp.pad(x, ((0, 0), (pad, pad), (pad, pad), (0, 0)),
                 constant_values=-jnp.inf)
    rows = N * Ho * Wo
    slices = []
    for dh in range(k):
        for dw in range(k):
            sl = jax.lax.slice(
                xp,
                (0, dh, dw, 0),
                (N, dh + (Ho - 1) * s + 1, dw + (Wo - 1) * s + 1, C),
                (1, s, s, 1),
            ).reshape(rows, C)
            slices.append(sl)
    out = _max9(slices)
    return out.reshape(N, Ho, Wo, C)


# --------------------------------------------------------------------------
# Parameter construction (deterministic, synthetic; pre-padded, bf16 weights)
# --------------------------------------------------------------------------
class _KeyGen:
    def __init__(self, seed):
        self._key = jax.random.PRNGKey(seed)

    def __call__(self):
        self._key, sub = jax.random.split(self._key)
        return sub


def _make_conv_bn(kg, cin, cout, kh, kw, cin_pad=None):
    """Conv weight in (Kp, Np) matmul layout (bf16, per-tap channel padded) +
    folded eval-mode BN affine (f32)."""
    if cin_pad is None:
        cin_pad = _round_up(cin, 128)
    fan_in = kh * kw * cin
    w = jax.random.normal(kg(), (kh, kw, cin, cout), jnp.float32) * math.sqrt(2.0 / fan_in)
    gamma = 1.0 + 0.1 * jax.random.normal(kg(), (cout,), jnp.float32)
    beta = 0.1 * jax.random.normal(kg(), (cout,), jnp.float32)
    mean = 0.1 * jax.random.normal(kg(), (cout,), jnp.float32)
    var = 1.0 + 0.1 * jax.random.uniform(kg(), (cout,), jnp.float32)
    eps = 1e-5
    scale = gamma / jnp.sqrt(var + eps)
    bias = beta - mean * scale

    np_ = _round_up(cout, 128)
    wp = jnp.pad(w, ((0, 0), (0, 0), (0, cin_pad - cin), (0, np_ - cout)))
    wp = wp.reshape(kh * kw * cin_pad, np_)
    k_valid = kh * kw * cin_pad
    kp = _round_up(k_valid, 128)
    wp = jnp.pad(wp, ((0, kp - k_valid), (0, 0))).astype(jnp.bfloat16)
    s_p = jnp.pad(scale.reshape(1, cout), ((0, 0), (0, np_ - cout)))
    t_p = jnp.pad(bias.reshape(1, cout), ((0, 0), (0, np_ - cout)))
    return {"w": wp, "scale": s_p, "bias": t_p, "k": (kh, kw),
            "cin_pad": cin_pad, "n": cout}


def _make_layer(kg, inplanes, planes, blocks, stride):
    layer = []
    for b in range(blocks):
        s = stride if b == 0 else 1
        ds = None
        if s != 1 or inplanes != planes * 4:
            ds = _make_conv_bn(kg, inplanes, planes * 4, 1, 1)
        blk = {
            "conv1": _make_conv_bn(kg, inplanes, planes, 1, 1),
            "conv2": _make_conv_bn(kg, planes, planes, 3, 3),
            "conv3": _make_conv_bn(kg, planes, planes * 4, 1, 1),
            "downsample": ds,
            "stride": s,
        }
        layer.append(blk)
        inplanes = planes * 4
    return layer, inplanes


def make_resnet101_params(seed=42):
    kg = _KeyGen(seed)
    params = {"stem": _make_conv_bn(kg, 3, 64, 7, 7, cin_pad=3)}
    inplanes = 64
    params["layer1"], inplanes = _make_layer(kg, inplanes, 64, 3, 1)
    params["layer2"], inplanes = _make_layer(kg, inplanes, 128, 4, 2)
    params["layer3"], inplanes = _make_layer(kg, inplanes, 256, 23, 2)
    params["layer4"], inplanes = _make_layer(kg, inplanes, 512, 3, 2)
    return params


# --------------------------------------------------------------------------
# Forward pass
# --------------------------------------------------------------------------
def conv_bn(x, p, stride, pad, relu, residual=None):
    """Conv + folded BN + optional ReLU (+ fused residual) via Pallas matmul.

    x: (N,H,W,Cp) bf16, Cp channel-padded (except the 3-channel stem input).
    Returns (N,Ho,Wo,Np) bf16 with Np = round_up(cout, 128); padded channels are 0.
    """
    kh, kw = p["k"]
    N = x.shape[0]
    if kh == 1 and kw == 1:
        if stride > 1:
            x = x[:, ::stride, ::stride, :]
        _, Ho, Wo, C = x.shape
        a_list = [x.reshape(N * Ho * Wo, C)]
    elif p["cin_pad"] % 128 == 0:
        # per-tap inputs; im2col reduction fused inside the matmul kernel
        a_list, (N, Ho, Wo) = conv_taps(x, kh, kw, stride, pad)
    else:
        # stem (3 input channels): classic concatenated patch matrix
        taps, (N, Ho, Wo) = conv_taps(x, kh, kw, stride, pad)
        a_list = [jnp.concatenate(taps, axis=-1)]

    M = N * Ho * Wo
    r2d = None if residual is None else residual.reshape(M, residual.shape[-1])
    y = matmul_affine(a_list, p["w"], p["scale"], p["bias"], r2d, relu=relu)
    if y.shape[0] != M:
        y = y[:M]
    return y.reshape(N, Ho, Wo, y.shape[-1])


def bottleneck(x, blk):
    identity = x
    out = conv_bn(x, blk["conv1"], stride=1, pad=0, relu=True)
    out = conv_bn(out, blk["conv2"], stride=blk["stride"], pad=1, relu=True)
    if blk["downsample"] is not None:
        identity = conv_bn(x, blk["downsample"], stride=blk["stride"],
                           pad=0, relu=False)
    # conv3 + BN + residual add + ReLU fused in a single Pallas matmul epilogue.
    out = conv_bn(out, blk["conv3"], stride=1, pad=0, relu=True,
                  residual=identity)
    return out


def resnet101_forward(params, x_nchw):
    """x_nchw: (N, 3, H, W) float32 -> [layer1, layer2, layer3, layer4] NCHW f32."""
    x = jnp.transpose(x_nchw, (0, 2, 3, 1)).astype(jnp.bfloat16)  # NCHW -> NHWC bf16
    x = conv_bn(x, params["stem"], stride=2, pad=3, relu=True)    # conv1+bn1+relu
    x = maxpool_3x3_s2_p1(x)                                      # maxpool
    outputs = []
    for name in ("layer1", "layer2", "layer3", "layer4"):
        for blk in params[name]:
            x = bottleneck(x, blk)
        c_true = params[name][-1]["conv3"]["n"]
        out = x if x.shape[-1] == c_true else x[..., :c_true]
        outputs.append(jnp.transpose(out, (0, 3, 1, 2)).astype(jnp.float32))
    return outputs


# --------------------------------------------------------------------------
if __name__ == "__main__":
    params = make_resnet101_params(seed=42)
    x = jax.random.normal(jax.random.PRNGKey(0), (2, 3, 64, 64), jnp.float32)

    outs = resnet101_forward(params, x)
    outs = jax.block_until_ready(outs)

    expected = [(2, 256, 16, 16), (2, 512, 8, 8), (2, 1024, 4, 4), (2, 2048, 2, 2)]
    got = [tuple(o.shape) for o in outs]
    assert got == expected, f"shape mismatch: {got} vs {expected}"
    assert all(bool(jnp.isfinite(o).all()) for o in outs), "non-finite values in outputs"

    print("KERNEL_OK")
</pallas_src>

<mosaic_0001>
module attributes {stable_mosaic.version = 11 : i64} {
  func.func @_mm_single_kernel(%arg0: i32, %arg1: i32, %arg2: memref<1024x256xbf16, #tpu.memory_space<vmem>>, %arg3: memref<256x128xbf16, #tpu.memory_space<vmem>>, %arg4: memref<1x128xf32, #tpu.memory_space<vmem>>, %arg5: memref<1x128xf32, #tpu.memory_space<vmem>>, %arg6: memref<1024x128xbf16, #tpu.memory_space<vmem>>) attributes {dimension_semantics = [#tpu.dimension_semantics<parallel>, #tpu.dimension_semantics<parallel>], iteration_bounds = array<i64: 2, 1>, scalar_prefetch = 0 : i64, scratch_operands = 0 : i64, tpu.core_type = #tpu.core_type<tc>, window_params = [{transform_indices = @transform_0, window_bounds = array<i64: 1024, 256>}, {transform_indices = @transform_1, window_bounds = array<i64: 256, 128>}, {transform_indices = @transform_2, window_bounds = array<i64: 1, 128>}, {transform_indices = @transform_3, window_bounds = array<i64: 1, 128>}, {transform_indices = @transform_4, window_bounds = array<i64: 1024, 128>}]} {
    %c0 = arith.constant 0 : index
    %c0_0 = arith.constant 0 : index
    %0 = vector.load %arg2[%c0, %c0_0] : memref<1024x256xbf16, #tpu.memory_space<vmem>>, vector<1024x256xbf16>
    %c0_1 = arith.constant 0 : index
    %c0_2 = arith.constant 0 : index
    %1 = vector.load %arg3[%c0_1, %c0_2] : memref<256x128xbf16, #tpu.memory_space<vmem>>, vector<256x128xbf16>
    %cst = arith.constant dense<0.000000e+00> : vector<1024x128xf32>
    %2 = tpu.matmul %0, %1, %cst {dimension_numbers = #tpu.dot_dimension_numbers<[1], [0], [0], [1], [0, 0, 1, 1], [], []>} : vector<1024x256xbf16>, vector<256x128xbf16>, vector<1024x128xf32> -> vector<1024x128xf32>
    %c0_3 = arith.constant 0 : index
    %c0_4 = arith.constant 0 : index
    %3 = vector.load %arg4[%c0_3, %c0_4] : memref<1x128xf32, #tpu.memory_space<vmem>>, vector<1x128xf32>
    %4 = vector.broadcast %3 : vector<1x128xf32> to vector<1024x128xf32>
    %5 = arith.mulf %2, %4 : vector<1024x128xf32>
    %c0_5 = arith.constant 0 : index
    %c0_6 = arith.constant 0 : index
    %6 = vector.load %arg5[%c0_5, %c0_6] : memref<1x128xf32, #tpu.memory_space<vmem>>, vector<1x128xf32>
    %7 = vector.broadcast %6 : vector<1x128xf32> to vector<1024x128xf32>
    %8 = arith.addf %5, %7 : vector<1024x128xf32>
    %cst_7 = arith.constant 0.000000e+00 : f32
    %9 = vector.broadcast %cst_7 : f32 to vector<1024x128xf32>
    %10 = arith.maximumf %8, %9 : vector<1024x128xf32>
    %11 = arith.truncf %10 : vector<1024x128xf32> to vector<1024x128xbf16>
    %c0_8 = arith.constant 0 : index
    %c0_9 = arith.constant 0 : index
    %12 = vector.load %arg6[%c0_8, %c0_9] : memref<1024x128xbf16, #tpu.memory_space<vmem>>, vector<1024x128xbf16>
    tpu.vector_store %arg6[%c0_8, %c0_9], %11 {strides = array<i32>} : memref<1024x128xbf16, #tpu.memory_space<vmem>>, vector<1024x128xbf16>,
    return
  }
  func.func @transform_0(%arg0: i32, %arg1: i32) -> (i32, i32) {
    %c0_i32 = arith.constant 0 : i32
    %c0_i32_0 = arith.constant 0 : i32
    return %arg0, %c0_i32 : i32, i32
  }
  func.func @transform_1(%arg0: i32, %arg1: i32) -> (i32, i32) {
    %c0_i32 = arith.constant 0 : i32
    %c0_i32_0 = arith.constant 0 : i32
    return %c0_i32, %arg1 : i32, i32
  }
  func.func @transform_2(%arg0: i32, %arg1: i32) -> (i32, i32) {
    %c0_i32 = arith.constant 0 : i32
    %c0_i32_0 = arith.constant 0 : i32
    return %c0_i32, %arg1 : i32, i32
  }
  func.func @transform_3(%arg0: i32, %arg1: i32) -> (i32, i32) {
    %c0_i32 = arith.constant 0 : i32
    %c0_i32_0 = arith.constant 0 : i32
    return %c0_i32, %arg1 : i32, i32
  }
  func.func @transform_4(%arg0: i32, %arg1: i32) -> (i32, i32) {
    %c0_i32 = arith.constant 0 : i32
    return %arg0, %arg1 : i32, i32
  }
}

</mosaic_0001>

<bundles_post_ra>
// kernel: matmul_affine.1
= control target key start
LH: loop header
LB: loop body
LE: loop exit
PB: predicated region body
PF: predicated region fallthrough
CT: control target
= control target key end

     0   :  { %9 = vsyncpa [#allocation3], 0  ;;  %s4748_s0 = inlined_call_operand.vmem [shape: bf16[2048,256], index: 0, kind: input, shape index: {}]   ;;  %s4749_s1 = inlined_call_operand.vmem [shape: bf16[256,128], index: 1, kind: input, shape index: {}]   ;;  %s4750_s2 = inlined_call_operand.vmem [shape: f32[1,128], index: 2, kind: input, shape index: {}]   ;;  %s4751_s3 = inlined_call_operand.vmem [shape: f32[1,128], index: 3, kind: input, shape index: {}]   ;;  %s4752_s4 = inlined_call_operand.hbm [shape: bf16[2048,128], index: 4, kind: output, shape index: {}]  }
   0x1   :  { %11 = vsyncpa [#allocation3 + $0x1], 0  ;;  %s4078_s15 = smov 0   ;;  %s4080_s16 = smov 0  }
   0x2   :  { %s4082_s17 = smov 0   ;;  %s4084_s18 = smov 0  }
   0x3   :  { %s4086_s19 = smov 0   ;;  %s4088_s20 = smov 0  }
   0x4 LB: > { %s2867_s21 = sadd.s32 4294967295, %s4047_s20   ;;  %s2868_s22 = sadd.s32 4294967294, %s4047_s20   ;;  %s4047_s20 = sphi %s4088_s20, %s17_s20   ;;  %s4043_s19 = sphi %s4086_s19, %s4759_s19   ;;  %s4039_s18 = sphi %s4084_s18, %s4758_s18   ;;  %s4035_s17 = sphi %s4082_s17, %s4757_s17   ;;  %s4031_s16 = sphi %s4080_s16, %s4756_s16   ;;  %s4027_s15 = sphi %s4078_s15, %s4755_s15  }
   0x5   : > { %s29_s23 = sadd.s32 1, %s4043_s19  ;;  %s142_s24 = sadd.s32 1, %s4035_s17 }
   0x6   : > { %p31_p0 = scmp.ge.s32.totalorder %s29_s23, 2  ;;  %p152_p1 = scmp.ne.s32.totalorder %s4035_s17, %s4031_s16 }
   0x7   : > { %p153_p2 = scmp.eq.s32.totalorder %s2867_s21, 1  ;;  %p158_p3 = scmp.ne.s32.totalorder %s4031_s16, %s4027_s15 }
   0x8   : > { %s4761_s23 = smov (%p31_p0, %s29_s23), 0  ;;  %p159_p5 = scmp.eq.s32.totalorder %s2868_s22, 1 }
   0x9   : > { %p4118_p4 = por %p153_p2, %p152_p1  ;;  %s137_s26 = ssub.s32 %s4043_s19, %s4761_s23 }
   0xa   : > { %p2874_p6 = scmp.ge.s32.totalorder %s4047_s20, 1  ;;  %p140_p7 = scmp.eq.s32.totalorder %s137_s26, 0 }
   0xb   : > { %p4125_p8 = por %p159_p5, %p158_p3  ;;  %p206_p9 = scmp.lt.s32.totalorder %s4047_s20, 3 }
   0xc   : > { %s4131_s28 = scalar_select %p140_p7, %s4035_s17, %s142_s24  }
   0xd   : > { %p207_p10 = pnand %p2874_p6, %p206_p9 }
   0xe   : > { %s2876_s5 = sshll.u32 (!%p207_p10), %s4039_s18, 7  ;;  %s240_s13 = sand.u32 (!%p207_p10), 1, %s4031_s16  }
   0xf   : > { %210 = sbr.rel (%p207_p10) target bundleno = 552 (0x228), region = 36  ;;  %p244_p11 = scmp.lt.s32.totalorder (!%p207_p10), %s2876_s5, 255 }
  0x10   : > { %s2875_s14 = sshll.u32 (!%p207_p10), %s240_s13, 9  ;;  %s3287_s30 = sshll.u32 (!%p207_p10), %s4039_s18, 13 }
  0x11   : > { %s4352_s21 = scalar_lea.vmem (!%p207_p10), [#allocation2], %s2875_s14  ;;  %s4695_s8 = scalar_lea.hbm (!%p207_p10), %s4752_s4, %s3287_s30 }
  0x12   : > { %s4703_s18 = scalar_lea.sflag (!%p207_p10), [#allocation3], %s240_s13  ;;  %s4050_s10 = smov (!%p207_p10), [#allocation2]  }
  0x13   : > { %s3975_s11 = sshll.u32 (!%p207_p10), %s4050_s10, 4  ;;  %s3976_s11 = int_to_ptr.vmem [resolvable:$false] %s3975_s11 }
  0x14   : > { %v3761_v0 = vld [vmem:[%s4749_s1 + $0x38] sm:$0xff]   ;;  %v4049_v1 = vmov 0   ;;  %v3762_v2 = vld [vmem:[%s4749_s1 + $0x30] sm:$0xff]   ;;  %v3763_v3 = vld [vmem:[%s4749_s1 + $0x28] sm:$0xff]   ;;  %s4763_s5 = smov (!%p244_p11, %s2876_s5), 255 }
  0x15   : > { %1158 = vmatprep.subr.bf16.mxu0 %v4049_v1  ;;  %3671 = vmatprep.subr.bf16.mxu1 %v4049_v1  ;;  %v3764_v4 = vld [vmem:[%s4749_s1 + $0x20] sm:$0xff]   ;;  %s3158_s12 = sshll.u32 %s4763_s5, 3  ;;  %v3765_v5 = vld [vmem:[%s4749_s1 + $0x18] sm:$0xff]   ;;  %v3766_v7 = vld [vmem:[%s4749_s1 + $0x10] sm:$0xff]   ;;  %s2756_s5 = sshll.u32 %s4352_s21, 4  ;;  %s4697_s5 = int_to_ptr.vmem [resolvable:$true] %s2756_s5 }
  0x16   : > { %1159 = vmatpush1.bf16.msra.mxu0 %v3761_v0  ;;  %3687 = vmatpush1.bf16.msra.mxu1 %v3761_v0  ;;  %s4160_s24 = scalar_lea.vmem %s4748_s0, %s3158_s12  ;;  %v3767_v9 = vld [vmem:[%s4749_s1 + $0x8] sm:$0xff]   ;;  %v3768_v10 = vld [vmem:[%s4749_s1] sm:$0xff]   ;;  %v3769_v11 = vld [vmem:[%s4749_s1 + $0x78] sm:$0xff]   ;;  %s3971_s9 = scalar_lea.vmem %s4697_s5, 8192 }
  0x17   : > { %1160 = vmatprep.subr.bf16.mxu0 %v4049_v1  ;;  %3672 = vmatprep.subr.bf16.mxu1 %v4049_v1  ;;  %v3779_v6 = vld [vmem:[%s4160_s24 + $0x4] ss:$8 sps:$4 sm:$0xff]   ;;  %v3770_v12 = vld [vmem:[%s4749_s1 + $0x70] sm:$0xff]   ;;  %v3773_v15 = vld [vmem:[%s4749_s1 + $0x58] sm:$0xff]   ;;  %p3972_p12 = scmp.ne.s32.totalorder %s4697_s5, %s3971_s9  ;;  %s3977_s12 = scalar_lea.vmem %s3976_s11, 16384 }
  0x18   : > { %v3782_v8 = vld [vmem:[%s4160_s24 + $0x204] ss:$8 sps:$4 sm:$0xff]   ;;  %1190 = vmatprep.mubr.bf16.mxu0 %v3779_v6  ;;  %v3774_v16 = vld [vmem:[%s4749_s1 + $0x50] sm:$0xff]   ;;  %v3777_v19 = vld [vmem:[%s4160_s24] ss:$8 sps:$4 sm:$0xff]   ;;  %p3978_p1 = scmp.lt.s32.totalorder %s4697_s5, %s3976_s11  ;;  %p3979_p2 = scmp.lt.s32.totalorder %s3977_s12, %s3971_s9 }
  0x19   : > { %1446 = vmatprep.mubr.bf16.mxu1 %v3782_v8  ;;  %v3771_v13 = vld [vmem:[%s4749_s1 + $0x68] sm:$0xff]   ;;  %v3772_v14 = vld [vmem:[%s4749_s1 + $0x60] sm:$0xff]   ;;  %v3783_v21 = vld [vmem:[%s4160_s24 + $0x14] ss:$8 sps:$4 sm:$0xff]   ;;  %p3973_p13 = pnand %p3972_p12, %p4118_p4 }
  0x1a   : > { %1161 = vmatpush1.bf16.msra.mxu0 %v3762_v2  ;;  %3688 = vmatpush1.bf16.msra.mxu1 %v3762_v2  ;;  %v3775_v17 = vld [vmem:[%s4749_s1 + $0x48] sm:$0xff]   ;;  %v3776_v18 = vld [vmem:[%s4749_s1 + $0x40] sm:$0xff]   ;;  %v3785_v22 = vld [vmem:[%s4160_s24 + $0x214] ss:$8 sps:$4 sm:$0xff]   ;;  %p3980_p3 = por %p3979_p2, %p3978_p1 }
  0x1b   : > { %1162 = vmatprep.subr.bf16.mxu0 %v4049_v1  ;;  %3673 = vmatprep.subr.bf16.mxu1 %v4049_v1  ;;  %v3780_v20 = vld [vmem:[%s4160_s24 + $0x200] ss:$8 sps:$4 sm:$0xff]   ;;  %v3787_v23 = vld [vmem:[%s4160_s24 + $0x10] ss:$8 sps:$4 sm:$0xff]   ;;  %v3789_v25 = vld [vmem:[%s4160_s24 + $0x24] ss:$8 sps:$4 sm:$0xff]   ;;  %p3974_p0 = pneg %p3973_p13 }
  0x1c   : > { %v3788_v24 = vld [vmem:[%s4160_s24 + $0x210] ss:$8 sps:$4 sm:$0xff]   ;;  %v3791_v26 = vld [vmem:[%s4160_s24 + $0x224] ss:$8 sps:$4 sm:$0xff]   ;;  %v3793_v27 = vld [vmem:[%s4160_s24 + $0x20] ss:$8 sps:$4 sm:$0xff]  }
  0x1d   : > { %v3794_v28 = vld [vmem:[%s4160_s24 + $0x220] ss:$8 sps:$4 sm:$0xff]   ;;  %v3795_v29 = vld [vmem:[%s4160_s24 + $0x34] ss:$8 sps:$4 sm:$0xff]   ;;  %v3799_v31 = vld [vmem:[%s4160_s24 + $0x30] ss:$8 sps:$4 sm:$0xff]   ;;  %p3981_p5 = pnand %p3980_p3, %p3974_p0 }
  0x1e   : > { %1163 = vmatpush1.bf16.msra.mxu0 %v3763_v3  ;;  %3689 = vmatpush1.bf16.msra.mxu1 %v3763_v3  ;;  %v3797_v30 = vld [vmem:[%s4160_s24 + $0x234] ss:$8 sps:$4 sm:$0xff]   ;;  %v3800_v32 = vld [vmem:[%s4160_s24 + $0x230] ss:$8 sps:$4 sm:$0xff]   ;;  %v3801_v33 = vld [vmem:[%s4160_s24 + $0x44] ss:$8 sps:$4 sm:$0xff]  }
  0x1f   : > { %1164 = vmatprep.subr.bf16.mxu0 %v4049_v1  ;;  %3674 = vmatprep.subr.bf16.mxu1 %v4049_v1  ;;  %v3803_v34 = vld [vmem:[%s4160_s24 + $0x244] ss:$8 sps:$4 sm:$0xff]   ;;  %v3805_v35 = vld [vmem:[%s4160_s24 + $0x40] ss:$8 sps:$4 sm:$0xff]   ;;  %v3807_v37 = vld [vmem:[%s4160_s24 + $0x54] ss:$8 sps:$4 sm:$0xff]  }
  0x20   : > { %v3806_v36 = vld [vmem:[%s4160_s24 + $0x240] ss:$8 sps:$4 sm:$0xff]   ;;  %v3809_v38 = vld [vmem:[%s4160_s24 + $0x254] ss:$8 sps:$4 sm:$0xff]   ;;  %v3811_v39 = vld [vmem:[%s4160_s24 + $0x50] ss:$8 sps:$4 sm:$0xff]  }
  0x21   : > { %v3812_v40 = vld [vmem:[%s4160_s24 + $0x250] ss:$8 sps:$4 sm:$0xff]   ;;  %v3813_v41 = vld [vmem:[%s4160_s24 + $0x64] ss:$8 sps:$4 sm:$0xff]   ;;  %v3817_v43 = vld [vmem:[%s4160_s24 + $0x60] ss:$8 sps:$4 sm:$0xff]  }
  0x22   : > { %1165 = vmatpush1.bf16.msra.mxu0 %v3764_v4  ;;  %3690 = vmatpush1.bf16.msra.mxu1 %v3764_v4  ;;  %v3815_v42 = vld [vmem:[%s4160_s24 + $0x264] ss:$8 sps:$4 sm:$0xff]   ;;  %v3818_v44 = vld [vmem:[%s4160_s24 + $0x260] ss:$8 sps:$4 sm:$0xff]   ;;  %v3819_v45 = vld [vmem:[%s4160_s24 + $0x74] ss:$8 sps:$4 sm:$0xff]  }
  0x23   : > { %1166 = vmatprep.subr.bf16.mxu0 %v4049_v1  ;;  %3675 = vmatprep.subr.bf16.mxu1 %v4049_v1  ;;  %v3821_v46 = vld [vmem:[%s4160_s24 + $0x274] ss:$8 sps:$4 sm:$0xff]   ;;  %v3823_v47 = vld [vmem:[%s4160_s24 + $0x70] ss:$8 sps:$4 sm:$0xff]   ;;  %v3825_v49 = vld [vmem:[%s4160_s24 + $0x84] ss:$8 sps:$4 sm:$0xff]  }
  0x24   : > { %v3824_v48 = vld [vmem:[%s4160_s24 + $0x270] ss:$8 sps:$4 sm:$0xff]   ;;  %v3827_v50 = vld [vmem:[%s4160_s24 + $0x284] ss:$8 sps:$4 sm:$0xff]   ;;  %v3829_v51 = vld [vmem:[%s4160_s24 + $0x80] ss:$8 sps:$4 sm:$0xff]  }
  0x25   : > { %v3830_v52 = vld [vmem:[%s4160_s24 + $0x280] ss:$8 sps:$4 sm:$0xff]   ;;  %v3831_v53 = vld [vmem:[%s4160_s24 + $0x94] ss:$8 sps:$4 sm:$0xff]   ;;  %v3835_v55 = vld [vmem:[%s4160_s24 + $0x90] ss:$8 sps:$4 sm:$0xff]  }
  0x26   : > { %1167 = vmatpush1.bf16.msra.mxu0 %v3765_v5  ;;  %3691 = vmatpush1.bf16.msra.mxu1 %v3765_v5  ;;  %v3833_v54 = vld [vmem:[%s4160_s24 + $0x294] ss:$8 sps:$4 sm:$0xff]   ;;  %v3836_v56 = vld [vmem:[%s4160_s24 + $0x290] ss:$8 sps:$4 sm:$0xff]   ;;  %v3837_v57 = vld [vmem:[%s4160_s24 + $0xa4] ss:$8 sps:$4 sm:$0xff]  }
  0x27   : > { %1168 = vmatprep.subr.bf16.mxu0 %v4049_v1  ;;  %3676 = vmatprep.subr.bf16.mxu1 %v4049_v1  ;;  %v3839_v58 = vld [vmem:[%s4160_s24 + $0x2a4] ss:$8 sps:$4 sm:$0xff]   ;;  %v3841_v59 = vld [vmem:[%s4160_s24 + $0xa0] ss:$8 sps:$4 sm:$0xff]   ;;  %v3843_v61 = vld [vmem:[%s4160_s24 + $0xb4] ss:$8 sps:$4 sm:$0xff]  }
  0x28   : > { %v3842_v60 = vld [vmem:[%s4160_s24 + $0x2a0] ss:$8 sps:$4 sm:$0xff]   ;;  %v3845_v62 = vld [vmem:[%s4160_s24 + $0x2b4] ss:$8 sps:$4 sm:$0xff]   ;;  %v3847_v63 = vld [vmem:[%s4160_s24 + $0xb0] ss:$8 sps:$4 sm:$0xff]  }
  0x29   : > { %v3848_v0 = vld [vmem:[%s4160_s24 + $0x2b0] ss:$8 sps:$4 sm:$0xff]   ;;  %v3851_v2 = vld [vmem:[%s4160_s24 + $0x2c4] ss:$8 sps:$4 sm:$0xff]   ;;  %v3853_v3 = vld [vmem:[%s4160_s24 + $0xc0] ss:$8 sps:$4 sm:$0xff]  }
  0x2a   : > { %1169 = vmatpush1.bf16.msra.mxu0 %v3766_v7  ;;  %3692 = vmatpush1.bf16.msra.mxu1 %v3766_v7  ;;  %v3854_v4 = vld [vmem:[%s4160_s24 + $0x2c0] ss:$8 sps:$4 sm:$0xff]   ;;  %v3855_v5 = vld [vmem:[%s4160_s24 + $0xd4] ss:$8 sps:$4 sm:$0xff]   ;;  %v3859_v7 = vld [vmem:[%s4160_s24 + $0xd0] ss:$8 sps:$4 sm:$0xff]  }
  0x2b   : > { %1170 = vmatprep.subr.bf16.mxu0 %v4049_v1  ;;  %3677 = vmatprep.subr.bf16.mxu1 %v4049_v1  ;;  %v3857_v6 = vld [vmem:[%s4160_s24 + $0x2d4] ss:$8 sps:$4 sm:$0xff]   ;;  %v3860_v8 = vld [vmem:[%s4160_s24 + $0x2d0] ss:$8 sps:$4 sm:$0xff]  }
  0x2e   : > { %1171 = vmatpush1.bf16.msra.mxu0 %v3767_v9  ;;  %3693 = vmatpush1.bf16.msra.mxu1 %v3767_v9  ;;  %v3861_v9 = vld [vmem:[%s4160_s24 + $0xe4] ss:$8 sps:$4 sm:$0xff]  }
  0x2f   : > { %1172 = vmatprep.subr.bf16.mxu0 %v4049_v1  ;;  %3678 = vmatprep.subr.bf16.mxu1 %v4049_v1 }
  0x32   : > { %1173 = vmatpush1.bf16.msra.mxu0 %v3768_v10  ;;  %3694 = vmatpush1.bf16.msra.mxu1 %v3768_v10  ;;  %v3863_v10 = vld [vmem:[%s4160_s24 + $0x2e4] ss:$8 sps:$4 sm:$0xff]  }
  0x33   : > { %1174 = vmatprep.subr.bf16.mxu0 %v4049_v1  ;;  %3679 = vmatprep.subr.bf16.mxu1 %v4049_v1 }
  0x36   : > { %1175 = vmatpush2.bf16.msra.mxu0 %v3769_v11  ;;  %3695 = vmatpush2.bf16.msra.mxu1 %v3769_v11  ;;  %v3865_v11 = vld [vmem:[%s4160_s24 + $0xe0] ss:$8 sps:$4 sm:$0xff]  }
  0x37   : > { %1176 = vmatprep.subr.bf16.mxu0 %v4049_v1  ;;  %3680 = vmatprep.subr.bf16.mxu1 %v4049_v1 }
  0x3a   : > { %1177 = vmatpush2.bf16.msra.mxu0 %v3770_v12  ;;  %3696 = vmatpush2.bf16.msra.mxu1 %v3770_v12  ;;  %v3866_v12 = vld [vmem:[%s4160_s24 + $0x2e0] ss:$8 sps:$4 sm:$0xff]  }
  0x3b   : > { %1178 = vmatprep.subr.bf16.mxu0 %v4049_v1  ;;  %3681 = vmatprep.subr.bf16.mxu1 %v4049_v1 }
  0x3e   : > { %1179 = vmatpush2.bf16.msra.mxu0 %v3771_v13  ;;  %3697 = vmatpush2.bf16.msra.mxu1 %v3771_v13  ;;  %v3867_v13 = vld [vmem:[%s4160_s24 + $0xf4] ss:$8 sps:$4 sm:$0xff]  }
  0x3f   : > { %1180 = vmatprep.subr.bf16.mxu0 %v4049_v1  ;;  %3682 = vmatprep.subr.bf16.mxu1 %v4049_v1 }
  0x42   : > { %1181 = vmatpush2.bf16.msra.mxu0 %v3772_v14  ;;  %3698 = vmatpush2.bf16.msra.mxu1 %v3772_v14  ;;  %v3869_v14 = vld [vmem:[%s4160_s24 + $0x2f4] ss:$8 sps:$4 sm:$0xff]  }
  0x43   : > { %1182 = vmatprep.subr.bf16.mxu0 %v4049_v1  ;;  %3683 = vmatprep.subr.bf16.mxu1 %v4049_v1 }
  0x46   : > { %1183 = vmatpush2.bf16.msra.mxu0 %v3773_v15  ;;  %3699 = vmatpush2.bf16.msra.mxu1 %v3773_v15  ;;  %v3871_v15 = vld [vmem:[%s4160_s24 + $0xf0] ss:$8 sps:$4 sm:$0xff]  }
  0x47   : > { %1184 = vmatprep.subr.bf16.mxu0 %v4049_v1  ;;  %3684 = vmatprep.subr.bf16.mxu1 %v4049_v1 }
  0x4a   : > { %1185 = vmatpush2.bf16.msra.mxu0 %v3774_v16  ;;  %3700 = vmatpush2.bf16.msra.mxu1 %v3774_v16  ;;  %v3872_v16 = vld [vmem:[%s4160_s24 + $0x2f0] ss:$8 sps:$4 sm:$0xff]  }
  0x4b   : > { %1186 = vmatprep.subr.bf16.mxu0 %v4049_v1  ;;  %3685 = vmatprep.subr.bf16.mxu1 %v4049_v1 }
  0x4e   : > { %1187 = vmatpush2.bf16.msra.mxu0 %v3775_v17  ;;  %3701 = vmatpush2.bf16.msra.mxu1 %v3775_v17  ;;  %v3873_v17 = vld [vmem:[%s4160_s24 + $0x104] ss:$8 sps:$4 sm:$0xff]  }
  0x4f   : > { %1188 = vmatprep.subr.bf16.mxu0 %v4049_v1  ;;  %3686 = vmatprep.subr.bf16.mxu1 %v4049_v1  ;;  %v3849_v1 = vld [vmem:[%s4160_s24 + $0xc4] ss:$8 sps:$4 sm:$0xff]  }
  0x52   : > { %1189 = vmatpush2.bf16.msra.mxu0 %v3776_v18  ;;  %3702 = vmatpush2.bf16.msra.mxu1 %v3776_v18  ;;  %v3875_v18 = vld [vmem:[%s4160_s24 + $0x304] ss:$8 sps:$4 sm:$0xff]  }
  0x55   : > { %1191 = vmatmul.mubr.bf16.vlgmr.msra.gmra.mxu0 %v3777_v19  ;;  %1447 = vmatmul.mubr.bf16.vlgmr.msra.gmra.mxu1 %v3780_v20  ;;  %v3877_v19 = vld [vmem:[%s4160_s24 + $0x100] ss:$8 sps:$4 sm:$0xff]  }
  0x56   : > { %1198 = vmatprep.mubr.bf16.mxu0 %v3783_v21  ;;  %1454 = vmatprep.mubr.bf16.mxu1 %v3785_v22  ;;  %v3878_v20 = vld [vmem:[%s4160_s24 + $0x300] ss:$8 sps:$4 sm:$0xff]   ;;  %v3879_v21 = vld [vmem:[%s4160_s24 + $0x114] ss:$8 sps:$4 sm:$0xff]  }
  0x57   : > { %v3881_v22 = vld [vmem:[%s4160_s24 + $0x314] ss:$8 sps:$4 sm:$0xff]  }
  0x5d   : > { %1199 = vmatmul.mubr.bf16.gmra.mxu0 %v3787_v23  ;;  %1455 = vmatmul.mubr.bf16.gmra.mxu1 %v3788_v24  ;;  %v3883_v23 = vld [vmem:[%s4160_s24 + $0x110] ss:$8 sps:$4 sm:$0xff]  }
  0x5e   : > { %1206 = vmatprep.mubr.bf16.mxu0 %v3789_v25  ;;  %1462 = vmatprep.mubr.bf16.mxu1 %v3791_v26  ;;  %v3884_v24 = vld [vmem:[%s4160_s24 + $0x310] ss:$8 sps:$4 sm:$0xff]   ;;  %v3885_v25 = vld [vmem:[%s4160_s24 + $0x124] ss:$8 sps:$4 sm:$0xff]  }
  0x5f   : > { %v3887_v26 = vld [vmem:[%s4160_s24 + $0x324] ss:$8 sps:$4 sm:$0xff]  }
  0x65   : > { %1207 = vmatmul.mubr.bf16.gmra.mxu0 %v3793_v27  ;;  %1463 = vmatmul.mubr.bf16.gmra.mxu1 %v3794_v28  ;;  %v3889_v27 = vld [vmem:[%s4160_s24 + $0x120] ss:$8 sps:$4 sm:$0xff]  }
  0x66   : > { %1214 = vmatprep.mubr.bf16.mxu0 %v3795_v29  ;;  %1470 = vmatprep.mubr.bf16.mxu1 %v3797_v30  ;;  %v3890_v28 = vld [vmem:[%s4160_s24 + $0x320] ss:$8 sps:$4 sm:$0xff]   ;;  %v3891_v29 = vld [vmem:[%s4160_s24 + $0x134] ss:$8 sps:$4 sm:$0xff]  }
  0x67   : > { %v3893_v30 = vld [vmem:[%s4160_s24 + $0x334] ss:$8 sps:$4 sm:$0xff]  }
  0x6d   : > { %1215 = vmatmul.mubr.bf16.gmra.mxu0 %v3799_v31  ;;  %1471 = vmatmul.mubr.bf16.gmra.mxu1 %v3800_v32  ;;  %v3895_v31 = vld [vmem:[%s4160_s24 + $0x130] ss:$8 sps:$4 sm:$0xff]  }
  0x6e   : > { %1222 = vmatprep.mubr.bf16.mxu0 %v3801_v33  ;;  %1478 = vmatprep.mubr.bf16.mxu1 %v3803_v34  ;;  %v3896_v32 = vld [vmem:[%s4160_s24 + $0x330] ss:$8 sps:$4 sm:$0xff]   ;;  %v3897_v33 = vld [vmem:[%s4160_s24 + $0x144] ss:$8 sps:$4 sm:$0xff]  }
  0x6f   : > { %v3899_v34 = vld [vmem:[%s4160_s24 + $0x344] ss:$8 sps:$4 sm:$0xff]  }
  0x75   : > { %1223 = vmatmul.mubr.bf16.gmra.mxu0 %v3805_v35  ;;  %1479 = vmatmul.mubr.bf16.gmra.mxu1 %v3806_v36  ;;  %v3901_v35 = vld [vmem:[%s4160_s24 + $0x140] ss:$8 sps:$4 sm:$0xff]  }
  0x76   : > { %1230 = vmatprep.mubr.bf16.mxu0 %v3807_v37  ;;  %1486 = vmatprep.mubr.bf16.mxu1 %v3809_v38  ;;  %v3902_v36 = vld [vmem:[%s4160_s24 + $0x340] ss:$8 sps:$4 sm:$0xff]   ;;  %v3903_v37 = vld [vmem:[%s4160_s24 + $0x154] ss:$8 sps:$4 sm:$0xff]  }
  0x77   : > { %v3905_v38 = vld [vmem:[%s4160_s24 + $0x354] ss:$8 sps:$4 sm:$0xff]  }
  0x7d   : > { %1231 = vmatmul.mubr.bf16.gmra.mxu0 %v3811_v39  ;;  %1487 = vmatmul.mubr.bf16.gmra.mxu1 %v3812_v40  ;;  %v3907_v39 = vld [vmem:[%s4160_s24 + $0x150] ss:$8 sps:$4 sm:$0xff]  }
  0x7e   : > { %1238 = vmatprep.mubr.bf16.mxu0 %v3813_v41  ;;  %1494 = vmatprep.mubr.bf16.mxu1 %v3815_v42  ;;  %v3908_v40 = vld [vmem:[%s4160_s24 + $0x350] ss:$8 sps:$4 sm:$0xff]   ;;  %v3909_v41 = vld [vmem:[%s4160_s24 + $0x164] ss:$8 sps:$4 sm:$0xff]  }
  0x7f   : > { %v3911_v42 = vld [vmem:[%s4160_s24 + $0x364] ss:$8 sps:$4 sm:$0xff]  }
  0x85   : > { %1239 = vmatmul.mubr.bf16.gmra.mxu0 %v3817_v43  ;;  %1495 = vmatmul.mubr.bf16.gmra.mxu1 %v3818_v44  ;;  %v3913_v43 = vld [vmem:[%s4160_s24 + $0x160] ss:$8 sps:$4 sm:$0xff]  }
  0x86   : > { %1246 = vmatprep.mubr.bf16.mxu0 %v3819_v45  ;;  %1502 = vmatprep.mubr.bf16.mxu1 %v3821_v46  ;;  %v3914_v44 = vld [vmem:[%s4160_s24 + $0x360] ss:$8 sps:$4 sm:$0xff]   ;;  %v3915_v45 = vld [vmem:[%s4160_s24 + $0x174] ss:$8 sps:$4 sm:$0xff]  }
  0x87   : > { %v3917_v46 = vld [vmem:[%s4160_s24 + $0x374] ss:$8 sps:$4 sm:$0xff]  }
  0x8d   : > { %1247 = vmatmul.mubr.bf16.gmra.mxu0 %v3823_v47  ;;  %1503 = vmatmul.mubr.bf16.gmra.mxu1 %v3824_v48  ;;  %v3919_v47 = vld [vmem:[%s4160_s24 + $0x170] ss:$8 sps:$4 sm:$0xff]  }
  0x8e   : > { %1254 = vmatprep.mubr.bf16.mxu0 %v3825_v49  ;;  %1510 = vmatprep.mubr.bf16.mxu1 %v3827_v50  ;;  %v3920_v48 = vld [vmem:[%s4160_s24 + $0x370] ss:$8 sps:$4 sm:$0xff]   ;;  %v3921_v49 = vld [vmem:[%s4160_s24 + $0x184] ss:$8 sps:$4 sm:$0xff]  }
  0x8f   : > { %v3923_v50 = vld [vmem:[%s4160_s24 + $0x384] ss:$8 sps:$4 sm:$0xff]  }
  0x95   : > { %1255 = vmatmul.mubr.bf16.gmra.mxu0 %v3829_v51  ;;  %1511 = vmatmul.mubr.bf16.gmra.mxu1 %v3830_v52  ;;  %v3925_v51 = vld [vmem:[%s4160_s24 + $0x180] ss:$8 sps:$4 sm:$0xff]  }
  0x96   : > { %1262 = vmatprep.mubr.bf16.mxu0 %v3831_v53  ;;  %1518 = vmatprep.mubr.bf16.mxu1 %v3833_v54  ;;  %v3926_v52 = vld [vmem:[%s4160_s24 + $0x380] ss:$8 sps:$4 sm:$0xff]   ;;  %v3927_v53 = vld [vmem:[%s4160_s24 + $0x194] ss:$8 sps:$4 sm:$0xff]  }
  0x97   : > { %v3929_v54 = vld [vmem:[%s4160_s24 + $0x394] ss:$8 sps:$4 sm:$0xff]  }
  0x9d   : > { %1263 = vmatmul.mubr.bf16.gmra.mxu0 %v3835_v55  ;;  %1519 = vmatmul.mubr.bf16.gmra.mxu1 %v3836_v56  ;;  %v4324_v55 = vld [vmem:[%s4750_s2] ss:$0 sm:$0xff] }
  0x9e   : > { %1270 = vmatprep.mubr.bf16.mxu0 %v3837_v57  ;;  %1526 = vmatprep.mubr.bf16.mxu1 %v3839_v58 }
  0xa5   : > { %1271 = vmatmul.mubr.bf16.gmra.mxu0 %v3841_v59  ;;  %1527 = vmatmul.mubr.bf16.gmra.mxu1 %v3842_v60  ;;  %v4330_v59 = vld [vmem:[%s4751_s3] ss:$0 sm:$0xff] }
  0xa6   : > { %1278 = vmatprep.mubr.bf16.mxu0 %v3843_v61  ;;  %1534 = vmatprep.mubr.bf16.mxu1 %v3845_v62 }
  0xad   : > { %1279 = vmatmul.mubr.bf16.gmra.mxu0 %v3847_v63  ;;  %1535 = vmatmul.mubr.bf16.gmra.mxu1 %v3848_v0 }
  0xae   : > { %1286 = vmatprep.mubr.bf16.mxu0 %v3849_v1  ;;  %1542 = vmatprep.mubr.bf16.mxu1 %v3851_v2 }
  0xb5   : > { %1287 = vmatmul.mubr.bf16.gmra.mxu0 %v3853_v3  ;;  %1543 = vmatmul.mubr.bf16.gmra.mxu1 %v3854_v4  ;;  %v3931_v3 = vld [vmem:[%s4160_s24 + $0x190] ss:$8 sps:$4 sm:$0xff]  }
  0xb6   : > { %1294 = vmatprep.mubr.bf16.mxu0 %v3855_v5  ;;  %1550 = vmatprep.mubr.bf16.mxu1 %v3857_v6  ;;  %v3932_v4 = vld [vmem:[%s4160_s24 + $0x390] ss:$8 sps:$4 sm:$0xff]  }
  0xbd   : > { %1295 = vmatmul.mubr.bf16.gmra.mxu0 %v3859_v7  ;;  %1551 = vmatmul.mubr.bf16.gmra.mxu1 %v3860_v8  ;;  %v3933_v7 = vld [vmem:[%s4160_s24 + $0x1a4] ss:$8 sps:$4 sm:$0xff]  }
  0xbe   : > { %1302 = vmatprep.mubr.bf16.mxu0 %v3861_v9  ;;  %1558 = vmatprep.mubr.bf16.mxu1 %v3863_v10  ;;  %v3935_v8 = vld [vmem:[%s4160_s24 + $0x3a4] ss:$8 sps:$4 sm:$0xff]  }
  0xc5   : > { %1303 = vmatmul.mubr.bf16.gmra.mxu0 %v3865_v11  ;;  %1559 = vmatmul.mubr.bf16.gmra.mxu1 %v3866_v12 }
  0xc6   : > { %1310 = vmatprep.mubr.bf16.mxu0 %v3867_v13  ;;  %1566 = vmatprep.mubr.bf16.mxu1 %v3869_v14 }
  0xcd   : > { %1311 = vmatmul.mubr.bf16.gmra.mxu0 %v3871_v15  ;;  %1567 = vmatmul.mubr.bf16.gmra.mxu1 %v3872_v16 }
  0xce   : > { %1318 = vmatprep.mubr.bf16.mxu0 %v3873_v17  ;;  %1574 = vmatprep.mubr.bf16.mxu1 %v3875_v18 }
  0xd5   : > { %1319 = vmatmul.mubr.bf16.gmra.mxu0 %v3877_v19  ;;  %1575 = vmatmul.mubr.bf16.gmra.mxu1 %v3878_v20 }
  0xd6   : > { %1326 = vmatprep.mubr.bf16.mxu0 %v3879_v21  ;;  %1582 = vmatprep.mubr.bf16.mxu1 %v3881_v22 }
  0xdd   : > { %1327 = vmatmul.mubr.bf16.gmra.mxu0 %v3883_v23  ;;  %1583 = vmatmul.mubr.bf16.gmra.mxu1 %v3884_v24 }
  0xde   : > { %1334 = vmatprep.mubr.bf16.mxu0 %v3885_v25  ;;  %1590 = vmatprep.mubr.bf16.mxu1 %v3887_v26 }
  0xe5   : > { %1335 = vmatmul.mubr.bf16.gmra.mxu0 %v3889_v27  ;;  %1591 = vmatmul.mubr.bf16.gmra.mxu1 %v3890_v28 }
  0xe6   : > { %1342 = vmatprep.mubr.bf16.mxu0 %v3891_v29  ;;  %1598 = vmatprep.mubr.bf16.mxu1 %v3893_v30  ;;  %v3937_v29 = vld [vmem:[%s4160_s24 + $0x1a0] ss:$8 sps:$4 sm:$0xff]  }
  0xe7   : > { %v3938_v30 = vld [vmem:[%s4160_s24 + $0x3a0] ss:$8 sps:$4 sm:$0xff]  }
  0xed   : > { %1343 = vmatmul.mubr.bf16.gmra.mxu0 %v3895_v31  ;;  %1599 = vmatmul.mubr.bf16.gmra.mxu1 %v3896_v32 }
  0xee   : > { %1350 = vmatprep.mubr.bf16.mxu0 %v3897_v33  ;;  %1606 = vmatprep.mubr.bf16.mxu1 %v3899_v34  ;;  %v3939_v33 = vld [vmem:[%s4160_s24 + $0x1b4] ss:$8 sps:$4 sm:$0xff]  }
  0xef   : > { %v3941_v34 = vld [vmem:[%s4160_s24 + $0x3b4] ss:$8 sps:$4 sm:$0xff]  }
  0xf5   : > { %1351 = vmatmul.mubr.bf16.gmra.mxu0 %v3901_v35  ;;  %1607 = vmatmul.mubr.bf16.gmra.mxu1 %v3902_v36 }
  0xf6   : > { %1358 = vmatprep.mubr.bf16.mxu0 %v3903_v37  ;;  %1614 = vmatprep.mubr.bf16.mxu1 %v3905_v38 }
  0xfd   : > { %1359 = vmatmul.mubr.bf16.gmra.mxu0 %v3907_v39  ;;  %1615 = vmatmul.mubr.bf16.gmra.mxu1 %v3908_v40 }
  0xfe   : > { %1366 = vmatprep.mubr.bf16.mxu0 %v3909_v41  ;;  %1622 = vmatprep.mubr.bf16.mxu1 %v3911_v42 }
 0x105   : > { %1367 = vmatmul.mubr.bf16.gmra.mxu0 %v3913_v43  ;;  %1623 = vmatmul.mubr.bf16.gmra.mxu1 %v3914_v44 }
 0x106   : > { %1374 = vmatprep.mubr.bf16.mxu0 %v3915_v45  ;;  %1630 = vmatprep.mubr.bf16.mxu1 %v3917_v46 }
 0x10d   : > { %1375 = vmatmul.mubr.bf16.gmra.mxu0 %v3919_v47  ;;  %1631 = vmatmul.mubr.bf16.gmra.mxu1 %v3920_v48 }
 0x10e   : > { %1382 = vmatprep.mubr.bf16.mxu0 %v3921_v49  ;;  %1638 = vmatprep.mubr.bf16.mxu1 %v3923_v50 }
 0x115   : > { %v1192_v56 = vpop.f32.mrf.mxu0  ;;  %1383 = vmatmul.mubr.bf16.gmra.mxu0 %v3925_v51  ;;  %v1448_v57 = vpop.f32.mrf.mxu1  ;;  %1639 = vmatmul.mubr.bf16.gmra.mxu1 %v3926_v52 }
 0x116   : > { %v1710_v58 = vmul.f32 %v4324_v55, %v1192_v56  ;;  %v1774_v60 = vmul.f32 %v4324_v55, %v1448_v57  ;;  %1390 = vmatprep.mubr.bf16.mxu0 %v3927_v53  ;;  %1646 = vmatprep.mubr.bf16.mxu1 %v3929_v54  ;;  %v3943_v56 = vld [vmem:[%s4160_s24 + $0x1b0] ss:$8 sps:$4 sm:$0xff]  }
 0x117   : > { %v1194_v61 = vpop.f32.mrf.mxu0  ;;  %v1450_v62 = vpop.f32.mrf.mxu1  ;;  %v3944_v57 = vld [vmem:[%s4160_s24 + $0x3b0] ss:$8 sps:$4 sm:$0xff]  }
 0x118   : > { %v1845_v63 = vadd.f32 %v4330_v59, %v1710_v58  ;;  %v1909_v0 = vadd.f32 %v4330_v59, %v1774_v60  ;;  %v3947_v61 = vld [vmem:[%s4160_s24 + $0x1c4] ss:$8 sps:$4 sm:$0xff]  }
 0x119   : > { %v1195_v1 = vpop.f32.mrf.mxu0  ;;  %v1451_v2 = vpop.f32.mrf.mxu1  ;;  %v3950_v62 = vld [vmem:[%s4160_s24 + $0x3c4] ss:$8 sps:$4 sm:$0xff]  }
 0x11a   : > { %v1711_v5 = vmul.f32 %v4324_v55, %v1195_v1  ;;  %v1775_v6 = vmul.f32 %v4324_v55, %v1451_v2  ;;  %v1973_v13 = vmax.f32 %v1845_v63, 0.0  ;;  %v2037_v14 = vmax.f32 %v1909_v0, 0.0 }
 0x11b   : > { %v1197_v9 = vpop.f32.mrf.mxu0  ;;  %v1453_v10 = vpop.f32.mrf.mxu1 }
 0x11c   : > { %v1846_v11 = vadd.f32 %v4330_v59, %v1711_v5  ;;  %v1910_v12 = vadd.f32 %v4330_v59, %v1775_v6 }
 0x11d   : > { %v1200_v15 = vpop.f32.mrf.mxu0  ;;  %1391 = vmatmul.mubr.bf16.gmra.mxu0 %v3931_v3  ;;  %v1456_v16 = vpop.f32.mrf.mxu1  ;;  %1647 = vmatmul.mubr.bf16.gmra.mxu1 %v3932_v4 }
 0x11e   : > { %v1974_v17 = vmax.f32 %v1846_v11, 0.0  ;;  %v2038_v18 = vmax.f32 %v1910_v12, 0.0  ;;  %v1712_v19 = vmul.f32 %v4324_v55, %v1200_v15  ;;  %v1776_v20 = vmul.f32 %v4324_v55, %v1456_v16  ;;  %1398 = vmatprep.mubr.bf16.mxu0 %v3933_v7  ;;  %1654 = vmatprep.mubr.bf16.mxu1 %v3935_v8 }
 0x11f   : > { %v1202_v21 = vpop.f32.mrf.mxu0  ;;  %v1458_v22 = vpop.f32.mrf.mxu1 }
 0x120   : > { %v3291_v23 = vpack.c.bf16 %v1974_v17, %v1973_v13  ;;  %v3451_v24 = vpack.c.bf16 %v2038_v18, %v2037_v14  ;;  %v1847_v25 = vadd.f32 %v4330_v59, %v1712_v19  ;;  %v1911_v26 = vadd.f32 %v4330_v59, %v1776_v20  ;;  %v3945_v19 = vld [vmem:[%s4160_s24 + $0x1c0] ss:$8 sps:$4 sm:$0xff]  }
 0x121   : > { %v1203_v27 = vpop.f32.mrf.mxu0  ;;  %v1459_v28 = vpop.f32.mrf.mxu1  ;;  %v3948_v20 = vld [vmem:[%s4160_s24 + $0x3c0] ss:$8 sps:$4 sm:$0xff]  }
 0x122   : > { %3292 = vst [vmem:[%s4352_s21] sm:$0xff] %v3291_v23   ;;  %3639 = vst [vmem:[%s4352_s21 + $0x100] sm:$0xff] %v3451_v24   ;;  %v1713_v31 = vmul.f32 %v4324_v55, %v1203_v27  ;;  %v1777_v32 = vmul.f32 %v4324_v55, %v1459_v28  ;;  %v1975_v39 = vmax.f32 %v1847_v25, 0.0  ;;  %v2039_v40 = vmax.f32 %v1911_v26, 0.0  ;;  %v3953_v23 = vld [vmem:[%s4160_s24 + $0x1d4] ss:$8 sps:$4 sm:$0xff]  }
 0x123   : > { %v1205_v35 = vpop.f32.mrf.mxu0  ;;  %v1461_v36 = vpop.f32.mrf.mxu1  ;;  %v3956_v24 = vld [vmem:[%s4160_s24 + $0x3d4] ss:$8 sps:$4 sm:$0xff]  }
 0x124   : > { %v1848_v37 = vadd.f32 %v4330_v59, %v1713_v31  ;;  %v1912_v38 = vadd.f32 %v4330_v59, %v1777_v32 }
 0x125   : > { %v1208_v41 = vpop.f32.mrf.mxu0  ;;  %1399 = vmatmul.mubr.bf16.gmra.mxu0 %v3937_v29  ;;  %v1464_v42 = vpop.f32.mrf.mxu1  ;;  %1655 = vmatmul.mubr.bf16.gmra.mxu1 %v3938_v30 }
 0x126   : > { %v1976_v43 = vmax.f32 %v1848_v37, 0.0  ;;  %v2040_v44 = vmax.f32 %v1912_v38, 0.0  ;;  %v1714_v45 = vmul.f32 %v4324_v55, %v1208_v41  ;;  %v1778_v46 = vmul.f32 %v4324_v55, %v1464_v42  ;;  %1406 = vmatprep.mubr.bf16.mxu0 %v3939_v33  ;;  %1662 = vmatprep.mubr.bf16.mxu1 %v3941_v34 }
 0x127   : > { %v1210_v47 = vpop.f32.mrf.mxu0  ;;  %v1466_v48 = vpop.f32.mrf.mxu1 }
 0x128   : > { %v3296_v49 = vpack.c.bf16 %v1976_v43, %v1975_v39  ;;  %v3456_v50 = vpack.c.bf16 %v2040_v44, %v2039_v40  ;;  %v1849_v51 = vadd.f32 %v4330_v59, %v1714_v45  ;;  %v1913_v52 = vadd.f32 %v4330_v59, %v1778_v46  ;;  %v3951_v45 = vld [vmem:[%s4160_s24 + $0x1d0] ss:$8 sps:$4 sm:$0xff]  }
 0x129   : > { %v1211_v53 = vpop.f32.mrf.mxu0  ;;  %v1467_v54 = vpop.f32.mrf.mxu1  ;;  %v3954_v46 = vld [vmem:[%s4160_s24 + $0x3d0] ss:$8 sps:$4 sm:$0xff]  }
 0x12a   : > { %3608 = vst [vmem:[%s4352_s21 + $0x8] sm:$0xff] %v3296_v49   ;;  %3640 = vst [vmem:[%s4352_s21 + $0x108] sm:$0xff] %v3456_v50   ;;  %v1715_v58 = vmul.f32 %v4324_v55, %v1211_v53  ;;  %v1779_v60 = vmul.f32 %v4324_v55, %v1467_v54  ;;  %v1977_v3 = vmax.f32 %v1849_v51, 0.0  ;;  %v2041_v4 = vmax.f32 %v1913_v52, 0.0  ;;  %v3959_v49 = vld [vmem:[%s4160_s24 + $0x1e4] ss:$8 sps:$4 sm:$0xff]  }
 0x12b   : > { %v1213_v63 = vpop.f32.mrf.mxu0  ;;  %v1469_v0 = vpop.f32.mrf.mxu1  ;;  %v3962_v50 = vld [vmem:[%s4160_s24 + $0x3e4] ss:$8 sps:$4 sm:$0xff]  }
 0x12c   : > { %v1850_v1 = vadd.f32 %v4330_v59, %v1715_v58  ;;  %v1914_v2 = vadd.f32 %v4330_v59, %v1779_v60 }
 0x12d   : > { %v1216_v5 = vpop.f32.mrf.mxu0  ;;  %1407 = vmatmul.mubr.bf16.gmra.mxu0 %v3943_v56  ;;  %v1472_v6 = vpop.f32.mrf.mxu1  ;;  %1663 = vmatmul.mubr.bf16.gmra.mxu1 %v3944_v57 }
 0x12e   : > { %v1978_v7 = vmax.f32 %v1850_v1, 0.0  ;;  %v2042_v8 = vmax.f32 %v1914_v2, 0.0  ;;  %v1716_v9 = vmul.f32 %v4324_v55, %v1216_v5  ;;  %v1780_v10 = vmul.f32 %v4324_v55, %v1472_v6  ;;  %1414 = vmatprep.mubr.bf16.mxu0 %v3947_v61  ;;  %1670 = vmatprep.mubr.bf16.mxu1 %v3950_v62 }
 0x12f   : > { %v1218_v11 = vpop.f32.mrf.mxu0  ;;  %v1474_v12 = vpop.f32.mrf.mxu1 }
 0x130   : > { %v3301_v13 = vpack.c.bf16 %v1978_v7, %v1977_v3  ;;  %v3461_v14 = vpack.c.bf16 %v2042_v8, %v2041_v4  ;;  %v1851_v15 = vadd.f32 %v4330_v59, %v1716_v9  ;;  %v1915_v16 = vadd.f32 %v4330_v59, %v1780_v10  ;;  %v3957_v9 = vld [vmem:[%s4160_s24 + $0x1e0] ss:$8 sps:$4 sm:$0xff]  }
 0x131   : > { %v1219_v17 = vpop.f32.mrf.mxu0  ;;  %v1475_v18 = vpop.f32.mrf.mxu1  ;;  %v3960_v10 = vld [vmem:[%s4160_s24 + $0x3e0] ss:$8 sps:$4 sm:$0xff]  }
 0x132   : > { %3609 = vst [vmem:[%s4352_s21 + $0x10] sm:$0xff] %v3301_v13   ;;  %3641 = vst [vmem:[%s4352_s21 + $0x110] sm:$0xff] %v3461_v14   ;;  %v1717_v21 = vmul.f32 %v4324_v55, %v1219_v17  ;;  %v1781_v22 = vmul.f32 %v4324_v55, %v1475_v18  ;;  %v1979_v29 = vmax.f32 %v1851_v15, 0.0  ;;  %v2043_v30 = vmax.f32 %v1915_v16, 0.0  ;;  %v3965_v13 = vld [vmem:[%s4160_s24 + $0x1f4] ss:$8 sps:$4 sm:$0xff]  }
 0x133   : > { %v1221_v25 = vpop.f32.mrf.mxu0  ;;  %v1477_v26 = vpop.f32.mrf.mxu1  ;;  %v3968_v14 = vld [vmem:[%s4160_s24 + $0x3f4] ss:$8 sps:$4 sm:$0xff]  }
 0x134   : > { %v1852_v27 = vadd.f32 %v4330_v59, %v1717_v21  ;;  %v1916_v28 = vadd.f32 %v4330_v59, %v1781_v22 }
 0x135   : > { %v1224_v31 = vpop.f32.mrf.mxu0  ;;  %1415 = vmatmul.mubr.bf16.gmra.mxu0 %v3945_v19  ;;  %v1480_v32 = vpop.f32.mrf.mxu1  ;;  %1671 = vmatmul.mubr.bf16.gmra.mxu1 %v3948_v20 }
 0x136   : > { %v1980_v33 = vmax.f32 %v1852_v27, 0.0  ;;  %v2044_v34 = vmax.f32 %v1916_v28, 0.0  ;;  %v1718_v35 = vmul.f32 %v4324_v55, %v1224_v31  ;;  %v1782_v36 = vmul.f32 %v4324_v55, %v1480_v32  ;;  %1422 = vmatprep.mubr.bf16.mxu0 %v3953_v23  ;;  %1678 = vmatprep.mubr.bf16.mxu1 %v3956_v24 }
 0x137   : > { %v1226_v37 = vpop.f32.mrf.mxu0  ;;  %v1482_v38 = vpop.f32.mrf.mxu1 }
 0x138   : > { %v3306_v39 = vpack.c.bf16 %v1980_v33, %v1979_v29  ;;  %v3466_v40 = vpack.c.bf16 %v2044_v34, %v2043_v30  ;;  %v1853_v41 = vadd.f32 %v4330_v59, %v1718_v35  ;;  %v1917_v42 = vadd.f32 %v4330_v59, %v1782_v36  ;;  %v3963_v35 = vld [vmem:[%s4160_s24 + $0x1f0] ss:$8 sps:$4 sm:$0xff]  }
 0x139   : > { %v1227_v43 = vpop.f32.mrf.mxu0  ;;  %v1483_v44 = vpop.f32.mrf.mxu1  ;;  %v3966_v36 = vld [vmem:[%s4160_s24 + $0x3f0] ss:$8 sps:$4 sm:$0xff]  }
 0x13a   : > { %3610 = vst [vmem:[%s4352_s21 + $0x18] sm:$0xff] %v3306_v39   ;;  %3642 = vst [vmem:[%s4352_s21 + $0x118] sm:$0xff] %v3466_v40   ;;  %v1719_v47 = vmul.f32 %v4324_v55, %v1227_v43  ;;  %v1783_v48 = vmul.f32 %v4324_v55, %v1483_v44  ;;  %v1981_v56 = vmax.f32 %v1853_v41, 0.0  ;;  %v2045_v57 = vmax.f32 %v1917_v42, 0.0 }
 0x13b   : > { %v1229_v51 = vpop.f32.mrf.mxu0  ;;  %v1485_v52 = vpop.f32.mrf.mxu1 }
 0x13c   : > { %v1854_v53 = vadd.f32 %v4330_v59, %v1719_v47  ;;  %v1918_v54 = vadd.f32 %v4330_v59, %v1783_v48 }
 0x13d   : > { %v1232_v58 = vpop.f32.mrf.mxu0  ;;  %1423 = vmatmul.mubr.bf16.gmra.mxu0 %v3951_v45  ;;  %v1488_v60 = vpop.f32.mrf.mxu1  ;;  %1679 = vmatmul.mubr.bf16.gmra.mxu1 %v3954_v46 }
 0x13e   : > { %v1982_v61 = vmax.f32 %v1854_v53, 0.0  ;;  %v2046_v62 = vmax.f32 %v1918_v54, 0.0  ;;  %v1720_v63 = vmul.f32 %v4324_v55, %v1232_v58  ;;  %v1784_v0 = vmul.f32 %v4324_v55, %v1488_v60  ;;  %1430 = vmatprep.mubr.bf16.mxu0 %v3959_v49  ;;  %1686 = vmatprep.mubr.bf16.mxu1 %v3962_v50 }
 0x13f   : > { %v1234_v1 = vpop.f32.mrf.mxu0  ;;  %v1490_v2 = vpop.f32.mrf.mxu1 }
 0x140   : > { %v3311_v3 = vpack.c.bf16 %v1982_v61, %v1981_v56  ;;  %v3471_v4 = vpack.c.bf16 %v2046_v62, %v2045_v57  ;;  %v1855_v5 = vadd.f32 %v4330_v59, %v1720_v63  ;;  %v1919_v6 = vadd.f32 %v4330_v59, %v1784_v0 }
 0x141   : > { %v1235_v7 = vpop.f32.mrf.mxu0  ;;  %v1491_v8 = vpop.f32.mrf.mxu1 }
 0x142   : > { %3611 = vst [vmem:[%s4352_s21 + $0x20] sm:$0xff] %v3311_v3   ;;  %3643 = vst [vmem:[%s4352_s21 + $0x120] sm:$0xff] %v3471_v4   ;;  %v1721_v11 = vmul.f32 %v4324_v55, %v1235_v7  ;;  %v1785_v12 = vmul.f32 %v4324_v55, %v1491_v8  ;;  %v1983_v19 = vmax.f32 %v1855_v5, 0.0  ;;  %v2047_v20 = vmax.f32 %v1919_v6, 0.0 }
 0x143   : > { %v1237_v15 = vpop.f32.mrf.mxu0  ;;  %v1493_v16 = vpop.f32.mrf.mxu1 }
 0x144   : > { %v1856_v17 = vadd.f32 %v4330_v59, %v1721_v11  ;;  %v1920_v18 = vadd.f32 %v4330_v59, %v1785_v12 }
 0x145   : > { %v1240_v21 = vpop.f32.mrf.mxu0  ;;  %1431 = vmatmul.mubr.bf16.gmra.mxu0 %v3957_v9  ;;  %v1496_v22 = vpop.f32.mrf.mxu1  ;;  %1687 = vmatmul.mubr.bf16.gmra.mxu1 %v3960_v10 }
 0x146   : > { %v1984_v23 = vmax.f32 %v1856_v17, 0.0  ;;  %v2048_v24 = vmax.f32 %v1920_v18, 0.0  ;;  %v1722_v25 = vmul.f32 %v4324_v55, %v1240_v21  ;;  %v1786_v26 = vmul.f32 %v4324_v55, %v1496_v22  ;;  %1438 = vmatprep.mubr.bf16.mxu0 %v3965_v13  ;;  %1694 = vmatprep.mubr.bf16.mxu1 %v3968_v14 }
 0x147   : > { %v1242_v27 = vpop.f32.mrf.mxu0  ;;  %v1498_v28 = vpop.f32.mrf.mxu1 }
 0x148   : > { %v3316_v29 = vpack.c.bf16 %v1984_v23, %v1983_v19  ;;  %v3476_v30 = vpack.c.bf16 %v2048_v24, %v2047_v20  ;;  %v1857_v31 = vadd.f32 %v4330_v59, %v1722_v25  ;;  %v1921_v32 = vadd.f32 %v4330_v59, %v1786_v26 }
 0x149   : > { %v1243_v33 = vpop.f32.mrf.mxu0  ;;  %v1499_v34 = vpop.f32.mrf.mxu1 }
 0x14a   : > { %3612 = vst [vmem:[%s4352_s21 + $0x28] sm:$0xff] %v3316_v29   ;;  %3644 = vst [vmem:[%s4352_s21 + $0x128] sm:$0xff] %v3476_v30   ;;  %v1723_v37 = vmul.f32 %v4324_v55, %v1243_v33  ;;  %v1787_v38 = vmul.f32 %v4324_v55, %v1499_v34  ;;  %v1985_v43 = vmax.f32 %v1857_v31, 0.0  ;;  %v2049_v44 = vmax.f32 %v1921_v32, 0.0 }
 0x14b   : > { %v1245_v39 = vpop.f32.mrf.mxu0  ;;  %v1501_v40 = vpop.f32.mrf.mxu1 }
 0x14c   : > { %v1858_v41 = vadd.f32 %v4330_v59, %v1723_v37  ;;  %v1922_v42 = vadd.f32 %v4330_v59, %v1787_v38 }
 0x14d   : > { %v1248_v45 = vpop.f32.mrf.mxu0  ;;  %1439 = vmatmul.mubr.bf16.gmra.mxu0 %v3963_v35  ;;  %v1504_v46 = vpop.f32.mrf.mxu1  ;;  %1695 = vmatmul.mubr.bf16.gmra.mxu1 %v3966_v36 }
 0x14e   : > { %v1986_v47 = vmax.f32 %v1858_v41, 0.0  ;;  %v2050_v48 = vmax.f32 %v1922_v42, 0.0  ;;  %v1724_v49 = vmul.f32 %v4324_v55, %v1248_v45  ;;  %v1788_v50 = vmul.f32 %v4324_v55, %v1504_v46 }
 0x14f   : > { %v1250_v51 = vpop.f32.mrf.mxu0  ;;  %v1506_v52 = vpop.f32.mrf.mxu1 }
 0x150   : > { %v3321_v53 = vpack.c.bf16 %v1986_v47, %v1985_v43  ;;  %v3481_v54 = vpack.c.bf16 %v2050_v48, %v2049_v44  ;;  %v1859_v56 = vadd.f32 %v4330_v59, %v1724_v49  ;;  %v1923_v57 = vadd.f32 %v4330_v59, %v1788_v50 }
 0x151   : > { %v1251_v58 = vpop.f32.mrf.mxu0  ;;  %v1507_v60 = vpop.f32.mrf.mxu1 }
 0x152   : > { %3613 = vst [vmem:[%s4352_s21 + $0x30] sm:$0xff] %v3321_v53   ;;  %3645 = vst [vmem:[%s4352_s21 + $0x130] sm:$0xff] %v3481_v54   ;;  %v1725_v61 = vmul.f32 %v4324_v55, %v1251_v58  ;;  %v1789_v62 = vmul.f32 %v4324_v55, %v1507_v60  ;;  %v1987_v3 = vmax.f32 %v1859_v56, 0.0  ;;  %v2051_v4 = vmax.f32 %v1923_v57, 0.0 }
 0x153   : > { %v1253_v63 = vpop.f32.mrf.mxu0  ;;  %v1509_v0 = vpop.f32.mrf.mxu1 }
 0x154   : > { %v1860_v1 = vadd.f32 %v4330_v59, %v1725_v61  ;;  %v1924_v2 = vadd.f32 %v4330_v59, %v1789_v62 }
 0x155   : > { %v1256_v5 = vpop.f32.mrf.mxu0  ;;  %v1512_v6 = vpop.f32.mrf.mxu1 }
 0x156   : > { %v1988_v7 = vmax.f32 %v1860_v1, 0.0  ;;  %v2052_v8 = vmax.f32 %v1924_v2, 0.0  ;;  %v1726_v9 = vmul.f32 %v4324_v55, %v1256_v5  ;;  %v1790_v10 = vmul.f32 %v4324_v55, %v1512_v6 }
 0x157   : > { %v1258_v11 = vpop.f32.mrf.mxu0  ;;  %v1514_v12 = vpop.f32.mrf.mxu1 }
 0x158   : > { %v3326_v13 = vpack.c.bf16 %v1988_v7, %v1987_v3  ;;  %v3486_v14 = vpack.c.bf16 %v2052_v8, %v2051_v4  ;;  %v1861_v15 = vadd.f32 %v4330_v59, %v1726_v9  ;;  %v1925_v16 = vadd.f32 %v4330_v59, %v1790_v10 }
 0x159   : > { %v1259_v17 = vpop.f32.mrf.mxu0  ;;  %v1515_v18 = vpop.f32.mrf.mxu1 }
 0x15a   : > { %3614 = vst [vmem:[%s4352_s21 + $0x38] sm:$0xff] %v3326_v13   ;;  %3646 = vst [vmem:[%s4352_s21 + $0x138] sm:$0xff] %v3486_v14   ;;  %v1727_v19 = vmul.f32 %v4324_v55, %v1259_v17  ;;  %v1791_v20 = vmul.f32 %v4324_v55, %v1515_v18  ;;  %v1989_v25 = vmax.f32 %v1861_v15, 0.0  ;;  %v2053_v26 = vmax.f32 %v1925_v16, 0.0 }
 0x15b   : > { %v1261_v21 = vpop.f32.mrf.mxu0  ;;  %v1517_v22 = vpop.f32.mrf.mxu1 }
 0x15c   : > { %v1862_v23 = vadd.f32 %v4330_v59, %v1727_v19  ;;  %v1926_v24 = vadd.f32 %v4330_v59, %v1791_v20 }
 0x15d   : > { %v1264_v27 = vpop.f32.mrf.mxu0  ;;  %v1520_v28 = vpop.f32.mrf.mxu1 }
 0x15e   : > { %v1990_v29 = vmax.f32 %v1862_v23, 0.0  ;;  %v2054_v30 = vmax.f32 %v1926_v24, 0.0  ;;  %v1728_v31 = vmul.f32 %v4324_v55, %v1264_v27  ;;  %v1792_v32 = vmul.f32 %v4324_v55, %v1520_v28 }
 0x15f   : > { %v1266_v33 = vpop.f32.mrf.mxu0  ;;  %v1522_v34 = vpop.f32.mrf.mxu1 }
 0x160   : > { %v3331_v35 = vpack.c.bf16 %v1990_v29, %v1989_v25  ;;  %v3491_v36 = vpack.c.bf16 %v2054_v30, %v2053_v26  ;;  %v1863_v37 = vadd.f32 %v4330_v59, %v1728_v31  ;;  %v1927_v38 = vadd.f32 %v4330_v59, %v1792_v32 }
 0x161   : > { %v1267_v39 = vpop.f32.mrf.mxu0  ;;  %v1523_v40 = vpop.f32.mrf.mxu1 }
 0x162   : > { %3615 = vst [vmem:[%s4352_s21 + $0x40] sm:$0xff] %v3331_v35   ;;  %3647 = vst [vmem:[%s4352_s21 + $0x140] sm:$0xff] %v3491_v36   ;;  %v1729_v41 = vmul.f32 %v4324_v55, %v1267_v39  ;;  %v1793_v42 = vmul.f32 %v4324_v55, %v1523_v40  ;;  %v1991_v47 = vmax.f32 %v1863_v37, 0.0  ;;  %v2055_v48 = vmax.f32 %v1927_v38, 0.0 }
 0x163   : > { %v1269_v43 = vpop.f32.mrf.mxu0  ;;  %v1525_v44 = vpop.f32.mrf.mxu1 }
 0x164   : > { %v1864_v45 = vadd.f32 %v4330_v59, %v1729_v41  ;;  %v1928_v46 = vadd.f32 %v4330_v59, %v1793_v42 }
 0x165   : > { %v1272_v49 = vpop.f32.mrf.mxu0  ;;  %v1528_v50 = vpop.f32.mrf.mxu1 }
 0x166   : > { %v1992_v51 = vmax.f32 %v1864_v45, 0.0  ;;  %v2056_v52 = vmax.f32 %v1928_v46, 0.0  ;;  %v1730_v53 = vmul.f32 %v4324_v55, %v1272_v49  ;;  %v1794_v54 = vmul.f32 %v4324_v55, %v1528_v50 }
 0x167   : > { %v1274_v56 = vpop.f32.mrf.mxu0  ;;  %v1530_v57 = vpop.f32.mrf.mxu1 }
 0x168   : > { %v3336_v58 = vpack.c.bf16 %v1992_v51, %v1991_v47  ;;  %v3496_v60 = vpack.c.bf16 %v2056_v52, %v2055_v48  ;;  %v1865_v61 = vadd.f32 %v4330_v59, %v1730_v53  ;;  %v1929_v62 = vadd.f32 %v4330_v59, %v1794_v54 }
 0x169   : > { %v1275_v63 = vpop.f32.mrf.mxu0  ;;  %v1531_v0 = vpop.f32.mrf.mxu1 }
 0x16a   : > { %3616 = vst [vmem:[%s4352_s21 + $0x48] sm:$0xff] %v3336_v58   ;;  %3648 = vst [vmem:[%s4352_s21 + $0x148] sm:$0xff] %v3496_v60   ;;  %v1731_v1 = vmul.f32 %v4324_v55, %v1275_v63  ;;  %v1795_v2 = vmul.f32 %v4324_v55, %v1531_v0  ;;  %v1993_v7 = vmax.f32 %v1865_v61, 0.0  ;;  %v2057_v8 = vmax.f32 %v1929_v62, 0.0 }
 0x16b   : > { %v1277_v3 = vpop.f32.mrf.mxu0  ;;  %v1533_v4 = vpop.f32.mrf.mxu1 }
 0x16c   : > { %v1866_v5 = vadd.f32 %v4330_v59, %v1731_v1  ;;  %v1930_v6 = vadd.f32 %v4330_v59, %v1795_v2 }
 0x16d   : > { %v1280_v9 = vpop.f32.mrf.mxu0  ;;  %v1536_v10 = vpop.f32.mrf.mxu1 }
 0x16e   : > { %v1994_v11 = vmax.f32 %v1866_v5, 0.0  ;;  %v2058_v12 = vmax.f32 %v1930_v6, 0.0  ;;  %v1732_v13 = vmul.f32 %v4324_v55, %v1280_v9  ;;  %v1796_v14 = vmul.f32 %v4324_v55, %v1536_v10 }
 0x16f   : > { %v1282_v15 = vpop.f32.mrf.mxu0  ;;  %v1538_v16 = vpop.f32.mrf.mxu1 }
 0x170   : > { %v3341_v17 = vpack.c.bf16 %v1994_v11, %v1993_v7  ;;  %v3501_v18 = vpack.c.bf16 %v2058_v12, %v2057_v8  ;;  %v1867_v19 = vadd.f32 %v4330_v59, %v1732_v13  ;;  %v1931_v20 = vadd.f32 %v4330_v59, %v1796_v14 }
 0x171   : > { %v1283_v21 = vpop.f32.mrf.mxu0  ;;  %v1539_v22 = vpop.f32.mrf.mxu1 }
 0x172   : > { %3617 = vst [vmem:[%s4352_s21 + $0x50] sm:$0xff] %v3341_v17   ;;  %3649 = vst [vmem:[%s4352_s21 + $0x150] sm:$0xff] %v3501_v18   ;;  %v1733_v23 = vmul.f32 %v4324_v55, %v1283_v21  ;;  %v1797_v24 = vmul.f32 %v4324_v55, %v1539_v22  ;;  %v1995_v29 = vmax.f32 %v1867_v19, 0.0  ;;  %v2059_v30 = vmax.f32 %v1931_v20, 0.0 }
 0x173   : > { %v1285_v25 = vpop.f32.mrf.mxu0  ;;  %v1541_v26 = vpop.f32.mrf.mxu1 }
 0x174   : > { %v1868_v27 = vadd.f32 %v4330_v59, %v1733_v23  ;;  %v1932_v28 = vadd.f32 %v4330_v59, %v1797_v24 }
 0x175   : > { %v1288_v31 = vpop.f32.mrf.mxu0  ;;  %v1544_v32 = vpop.f32.mrf.mxu1 }
 0x176   : > { %v1996_v33 = vmax.f32 %v1868_v27, 0.0  ;;  %v2060_v34 = vmax.f32 %v1932_v28, 0.0  ;;  %v1734_v35 = vmul.f32 %v4324_v55, %v1288_v31  ;;  %v1798_v36 = vmul.f32 %v4324_v55, %v1544_v32 }
 0x177   : > { %v1290_v37 = vpop.f32.mrf.mxu0  ;;  %v1546_v38 = vpop.f32.mrf.mxu1 }
 0x178   : > { %v3346_v39 = vpack.c.bf16 %v1996_v33, %v1995_v29  ;;  %v3506_v40 = vpack.c.bf16 %v2060_v34, %v2059_v30  ;;  %v1869_v41 = vadd.f32 %v4330_v59, %v1734_v35  ;;  %v1933_v42 = vadd.f32 %v4330_v59, %v1798_v36 }
 0x179   : > { %v1291_v43 = vpop.f32.mrf.mxu0  ;;  %v1547_v44 = vpop.f32.mrf.mxu1 }
 0x17a   : > { %3618 = vst [vmem:[%s4352_s21 + $0x58] sm:$0xff] %v3346_v39   ;;  %3650 = vst [vmem:[%s4352_s21 + $0x158] sm:$0xff] %v3506_v40   ;;  %v1735_v45 = vmul.f32 %v4324_v55, %v1291_v43  ;;  %v1799_v46 = vmul.f32 %v4324_v55, %v1547_v44  ;;  %v1997_v51 = vmax.f32 %v1869_v41, 0.0  ;;  %v2061_v52 = vmax.f32 %v1933_v42, 0.0 }
 0x17b   : > { %v1293_v47 = vpop.f32.mrf.mxu0  ;;  %v1549_v48 = vpop.f32.mrf.mxu1 }
 0x17c   : > { %v1870_v49 = vadd.f32 %v4330_v59, %v1735_v45  ;;  %v1934_v50 = vadd.f32 %v4330_v59, %v1799_v46 }
 0x17d   : > { %v1296_v53 = vpop.f32.mrf.mxu0  ;;  %v1552_v54 = vpop.f32.mrf.mxu1 }
 0x17e   : > { %v1998_v56 = vmax.f32 %v1870_v49, 0.0  ;;  %v2062_v57 = vmax.f32 %v1934_v50, 0.0  ;;  %v1736_v58 = vmul.f32 %v4324_v55, %v1296_v53  ;;  %v1800_v60 = vmul.f32 %v4324_v55, %v1552_v54 }
 0x17f   : > { %v1298_v61 = vpop.f32.mrf.mxu0  ;;  %v1554_v62 = vpop.f32.mrf.mxu1 }
 0x180   : > { %v3351_v63 = vpack.c.bf16 %v1998_v56, %v1997_v51  ;;  %v3511_v0 = vpack.c.bf16 %v2062_v57, %v2061_v52  ;;  %v1871_v1 = vadd.f32 %v4330_v59, %v1736_v58  ;;  %v1935_v2 = vadd.f32 %v4330_v59, %v1800_v60 }
 0x181   : > { %v1299_v3 = vpop.f32.mrf.mxu0  ;;  %v1555_v4 = vpop.f32.mrf.mxu1 }
 0x182   : > { %3619 = vst [vmem:[%s4352_s21 + $0x60] sm:$0xff] %v3351_v63   ;;  %3651 = vst [vmem:[%s4352_s21 + $0x160] sm:$0xff] %v3511_v0   ;;  %v1737_v5 = vmul.f32 %v4324_v55, %v1299_v3  ;;  %v1801_v6 = vmul.f32 %v4324_v55, %v1555_v4  ;;  %v1999_v11 = vmax.f32 %v1871_v1, 0.0  ;;  %v2063_v12 = vmax.f32 %v1935_v2, 0.0 }
 0x183   : > { %v1301_v7 = vpop.f32.mrf.mxu0  ;;  %v1557_v8 = vpop.f32.mrf.mxu1 }
 0x184   : > { %v1872_v9 = vadd.f32 %v4330_v59, %v1737_v5  ;;  %v1936_v10 = vadd.f32 %v4330_v59, %v1801_v6 }
 0x185   : > { %v1304_v13 = vpop.f32.mrf.mxu0  ;;  %v1560_v14 = vpop.f32.mrf.mxu1 }
 0x186   : > { %v2000_v15 = vmax.f32 %v1872_v9, 0.0  ;;  %v2064_v16 = vmax.f32 %v1936_v10, 0.0  ;;  %v1738_v17 = vmul.f32 %v4324_v55, %v1304_v13  ;;  %v1802_v18 = vmul.f32 %v4324_v55, %v1560_v14 }
 0x187   : > { %v1306_v19 = vpop.f32.mrf.mxu0  ;;  %v1562_v20 = vpop.f32.mrf.mxu1 }
 0x188   : > { %v3356_v21 = vpack.c.bf16 %v2000_v15, %v1999_v11  ;;  %v3516_v22 = vpack.c.bf16 %v2064_v16, %v2063_v12  ;;  %v1873_v23 = vadd.f32 %v4330_v59, %v1738_v17  ;;  %v1937_v24 = vadd.f32 %v4330_v59, %v1802_v18 }
 0x189   : > { %v1307_v25 = vpop.f32.mrf.mxu0  ;;  %v1563_v26 = vpop.f32.mrf.mxu1 }
 0x18a   : > { %3620 = vst [vmem:[%s4352_s21 + $0x68] sm:$0xff] %v3356_v21   ;;  %3652 = vst [vmem:[%s4352_s21 + $0x168] sm:$0xff] %v3516_v22   ;;  %v1739_v27 = vmul.f32 %v4324_v55, %v1307_v25  ;;  %v1803_v28 = vmul.f32 %v4324_v55, %v1563_v26  ;;  %v2001_v33 = vmax.f32 %v1873_v23, 0.0  ;;  %v2065_v34 = vmax.f32 %v1937_v24, 0.0 }
 0x18b   : > { %v1309_v29 = vpop.f32.mrf.mxu0  ;;  %v1565_v30 = vpop.f32.mrf.mxu1 }
 0x18c   : > { %v1874_v31 = vadd.f32 %v4330_v59, %v1739_v27  ;;  %v1938_v32 = vadd.f32 %v4330_v59, %v1803_v28 }
 0x18d   : > { %v1312_v35 = vpop.f32.mrf.mxu0  ;;  %v1568_v36 = vpop.f32.mrf.mxu1 }
 0x18e   : > { %v2002_v37 = vmax.f32 %v1874_v31, 0.0  ;;  %v2066_v38 = vmax.f32 %v1938_v32, 0.0  ;;  %v1740_v39 = vmul.f32 %v4324_v55, %v1312_v35  ;;  %v1804_v40 = vmul.f32 %v4324_v55, %v1568_v36 }
 0x18f   : > { %v1314_v41 = vpop.f32.mrf.mxu0  ;;  %v1570_v42 = vpop.f32.mrf.mxu1 }
 0x190   : > { %v3361_v43 = vpack.c.bf16 %v2002_v37, %v2001_v33  ;;  %v3521_v44 = vpack.c.bf16 %v2066_v38, %v2065_v34  ;;  %v1875_v45 = vadd.f32 %v4330_v59, %v1740_v39  ;;  %v1939_v46 = vadd.f32 %v4330_v59, %v1804_v40 }
 0x191   : > { %v1315_v47 = vpop.f32.mrf.mxu0  ;;  %v1571_v48 = vpop.f32.mrf.mxu1 }
 0x192   : > { %3621 = vst [vmem:[%s4352_s21 + $0x70] sm:$0xff] %v3361_v43   ;;  %3653 = vst [vmem:[%s4352_s21 + $0x170] sm:$0xff] %v3521_v44   ;;  %v1741_v49 = vmul.f32 %v4324_v55, %v1315_v47  ;;  %v1805_v50 = vmul.f32 %v4324_v55, %v1571_v48  ;;  %v2003_v56 = vmax.f32 %v1875_v45, 0.0  ;;  %v2067_v57 = vmax.f32 %v1939_v46, 0.0 }
 0x193   : > { %v1317_v51 = vpop.f32.mrf.mxu0  ;;  %v1573_v52 = vpop.f32.mrf.mxu1 }
 0x194   : > { %v1876_v53 = vadd.f32 %v4330_v59, %v1741_v49  ;;  %v1940_v54 = vadd.f32 %v4330_v59, %v1805_v50 }
 0x195   : > { %v1320_v58 = vpop.f32.mrf.mxu0  ;;  %v1576_v60 = vpop.f32.mrf.mxu1 }
 0x196   : > { %v2004_v61 = vmax.f32 %v1876_v53, 0.0  ;;  %v2068_v62 = vmax.f32 %v1940_v54, 0.0  ;;  %v1742_v63 = vmul.f32 %v4324_v55, %v1320_v58  ;;  %v1806_v0 = vmul.f32 %v4324_v55, %v1576_v60 }
 0x197   : > { %v1322_v1 = vpop.f32.mrf.mxu0  ;;  %v1578_v2 = vpop.f32.mrf.mxu1 }
 0x198   : > { %v3366_v3 = vpack.c.bf16 %v2004_v61, %v2003_v56  ;;  %v3526_v4 = vpack.c.bf16 %v2068_v62, %v2067_v57  ;;  %v1877_v5 = vadd.f32 %v4330_v59, %v1742_v63  ;;  %v1941_v6 = vadd.f32 %v4330_v59, %v1806_v0 }
 0x199   : > { %v1323_v7 = vpop.f32.mrf.mxu0  ;;  %v1579_v8 = vpop.f32.mrf.mxu1 }
 0x19a   : > { %3622 = vst [vmem:[%s4352_s21 + $0x78] sm:$0xff] %v3366_v3   ;;  %3654 = vst [vmem:[%s4352_s21 + $0x178] sm:$0xff] %v3526_v4   ;;  %v1743_v9 = vmul.f32 %v4324_v55, %v1323_v7  ;;  %v1807_v10 = vmul.f32 %v4324_v55, %v1579_v8  ;;  %v2005_v15 = vmax.f32 %v1877_v5, 0.0  ;;  %v2069_v16 = vmax.f32 %v1941_v6, 0.0  ;;  %v4553_v3 = vld [vmem:[%s4750_s2] ss:$0 sm:$0xff] }
 0x19b   : > { %v1325_v11 = vpop.f32.mrf.mxu0  ;;  %v1581_v12 = vpop.f32.mrf.mxu1  ;;  %v4560_v8 = vld [vmem:[%s4751_s3] ss:$0 sm:$0xff] }
 0x19c   : > { %v1878_v13 = vadd.f32 %v4330_v59, %v1743_v9  ;;  %v1942_v14 = vadd.f32 %v4330_v59, %v1807_v10 }
 0x19d   : > { %v1328_v17 = vpop.f32.mrf.mxu0  ;;  %v1584_v18 = vpop.f32.mrf.mxu1 }
 0x19e   : > { %v2006_v19 = vmax.f32 %v1878_v13, 0.0  ;;  %v2070_v20 = vmax.f32 %v1942_v14, 0.0  ;;  %v1744_v21 = vmul.f32 %v4324_v55, %v1328_v17  ;;  %v1808_v22 = vmul.f32 %v4324_v55, %v1584_v18 }
 0x19f   : > { %v1330_v23 = vpop.f32.mrf.mxu0  ;;  %v1586_v24 = vpop.f32.mrf.mxu1 }
 0x1a0   : > { %v3371_v25 = vpack.c.bf16 %v2006_v19, %v2005_v15  ;;  %v3531_v26 = vpack.c.bf16 %v2070_v20, %v2069_v16  ;;  %v1879_v27 = vadd.f32 %v4330_v59, %v1744_v21  ;;  %v1943_v28 = vadd.f32 %v4330_v59, %v1808_v22 }
 0x1a1   : > { %v1331_v29 = vpop.f32.mrf.mxu0  ;;  %v1587_v30 = vpop.f32.mrf.mxu1 }
 0x1a2   : > { %3623 = vst [vmem:[%s4352_s21 + $0x80] sm:$0xff] %v3371_v25   ;;  %3655 = vst [vmem:[%s4352_s21 + $0x180] sm:$0xff] %v3531_v26   ;;  %v1745_v31 = vmul.f32 %v4324_v55, %v1331_v29  ;;  %v1809_v32 = vmul.f32 %v4324_v55, %v1587_v30  ;;  %v2007_v37 = vmax.f32 %v1879_v27, 0.0  ;;  %v2071_v38 = vmax.f32 %v1943_v28, 0.0 }
 0x1a3   : > { %v1333_v33 = vpop.f32.mrf.mxu0  ;;  %v1589_v34 = vpop.f32.mrf.mxu1 }
 0x1a4   : > { %v1880_v35 = vadd.f32 %v4330_v59, %v1745_v31  ;;  %v1944_v36 = vadd.f32 %v4330_v59, %v1809_v32 }
 0x1a5   : > { %v1336_v39 = vpop.f32.mrf.mxu0  ;;  %v1592_v40 = vpop.f32.mrf.mxu1 }
 0x1a6   : > { %v2008_v41 = vmax.f32 %v1880_v35, 0.0  ;;  %v2072_v42 = vmax.f32 %v1944_v36, 0.0  ;;  %v1746_v43 = vmul.f32 %v4324_v55, %v1336_v39  ;;  %v1810_v44 = vmul.f32 %v4324_v55, %v1592_v40 }
 0x1a7   : > { %v1338_v45 = vpop.f32.mrf.mxu0  ;;  %v1594_v46 = vpop.f32.mrf.mxu1 }
 0x1a8   : > { %v3376_v47 = vpack.c.bf16 %v2008_v41, %v2007_v37  ;;  %v3536_v48 = vpack.c.bf16 %v2072_v42, %v2071_v38  ;;  %v1881_v49 = vadd.f32 %v4330_v59, %v1746_v43  ;;  %v1945_v50 = vadd.f32 %v4330_v59, %v1810_v44 }
 0x1a9   : > { %v1339_v51 = vpop.f32.mrf.mxu0  ;;  %v1595_v52 = vpop.f32.mrf.mxu1 }
 0x1aa   : > { %3624 = vst [vmem:[%s4352_s21 + $0x88] sm:$0xff] %v3376_v47   ;;  %3656 = vst [vmem:[%s4352_s21 + $0x188] sm:$0xff] %v3536_v48   ;;  %v1747_v53 = vmul.f32 %v4324_v55, %v1339_v51  ;;  %v1811_v54 = vmul.f32 %v4324_v55, %v1595_v52  ;;  %v2009_v61 = vmax.f32 %v1881_v49, 0.0  ;;  %v2073_v62 = vmax.f32 %v1945_v50, 0.0 }
 0x1ab   : > { %v1341_v56 = vpop.f32.mrf.mxu0  ;;  %v1597_v57 = vpop.f32.mrf.mxu1 }
 0x1ac   : > { %v1882_v58 = vadd.f32 %v4330_v59, %v1747_v53  ;;  %v1946_v60 = vadd.f32 %v4330_v59, %v1811_v54 }
 0x1ad   : > { %v1344_v63 = vpop.f32.mrf.mxu0  ;;  %v1600_v0 = vpop.f32.mrf.mxu1 }
 0x1ae   : > { %v2010_v1 = vmax.f32 %v1882_v58, 0.0  ;;  %v2074_v2 = vmax.f32 %v1946_v60, 0.0  ;;  %v1748_v55 = vmul.f32 %v4553_v3, %v1344_v63  ;;  %v1812_v4 = vmul.f32 %v4553_v3, %v1600_v0 }
 0x1af   : > { %v1346_v5 = vpop.f32.mrf.mxu0  ;;  %v1602_v6 = vpop.f32.mrf.mxu1 }
 0x1b0   : > { %v3381_v59 = vpack.c.bf16 %v2010_v1, %v2009_v61  ;;  %v3541_v7 = vpack.c.bf16 %v2074_v2, %v2073_v62  ;;  %v1883_v9 = vadd.f32 %v4560_v8, %v1748_v55  ;;  %v1947_v10 = vadd.f32 %v4560_v8, %v1812_v4 }
 0x1b1   : > { %v1347_v11 = vpop.f32.mrf.mxu0  ;;  %v1603_v12 = vpop.f32.mrf.mxu1 }
 0x1b2   : > { %3625 = vst [vmem:[%s4352_s21 + $0x90] sm:$0xff] %v3381_v59   ;;  %3657 = vst [vmem:[%s4352_s21 + $0x190] sm:$0xff] %v3541_v7   ;;  %v1749_v13 = vmul.f32 %v4553_v3, %v1347_v11  ;;  %v1813_v14 = vmul.f32 %v4553_v3, %v1603_v12  ;;  %v2011_v19 = vmax.f32 %v1883_v9, 0.0  ;;  %v2075_v20 = vmax.f32 %v1947_v10, 0.0 }
 0x1b3   : > { %v1349_v15 = vpop.f32.mrf.mxu0  ;;  %v1605_v16 = vpop.f32.mrf.mxu1 }
 0x1b4   : > { %v1884_v17 = vadd.f32 %v4560_v8, %v1749_v13  ;;  %v1948_v18 = vadd.f32 %v4560_v8, %v1813_v14 }
 0x1b5   : > { %v1352_v21 = vpop.f32.mrf.mxu0  ;;  %v1608_v22 = vpop.f32.mrf.mxu1 }
 0x1b6   : > { %v2012_v23 = vmax.f32 %v1884_v17, 0.0  ;;  %v2076_v24 = vmax.f32 %v1948_v18, 0.0  ;;  %v1750_v25 = vmul.f32 %v4553_v3, %v1352_v21  ;;  %v1814_v26 = vmul.f32 %v4553_v3, %v1608_v22 }
 0x1b7   : > { %v1354_v27 = vpop.f32.mrf.mxu0  ;;  %v1610_v28 = vpop.f32.mrf.mxu1 }
 0x1b8   : > { %v3386_v29 = vpack.c.bf16 %v2012_v23, %v2011_v19  ;;  %v3546_v30 = vpack.c.bf16 %v2076_v24, %v2075_v20  ;;  %v1885_v31 = vadd.f32 %v4560_v8, %v1750_v25  ;;  %v1949_v32 = vadd.f32 %v4560_v8, %v1814_v26 }
 0x1b9   : > { %v1355_v33 = vpop.f32.mrf.mxu0  ;;  %v1611_v34 = vpop.f32.mrf.mxu1 }
 0x1ba   : > { %3626 = vst [vmem:[%s4352_s21 + $0x98] sm:$0xff] %v3386_v29   ;;  %3658 = vst [vmem:[%s4352_s21 + $0x198] sm:$0xff] %v3546_v30   ;;  %v1751_v35 = vmul.f32 %v4553_v3, %v1355_v33  ;;  %v1815_v36 = vmul.f32 %v4553_v3, %v1611_v34  ;;  %v2013_v41 = vmax.f32 %v1885_v31, 0.0  ;;  %v2077_v42 = vmax.f32 %v1949_v32, 0.0 }
 0x1bb   : > { %v1357_v37 = vpop.f32.mrf.mxu0  ;;  %v1613_v38 = vpop.f32.mrf.mxu1 }
 0x1bc   : > { %v1886_v39 = vadd.f32 %v4560_v8, %v1751_v35  ;;  %v1950_v40 = vadd.f32 %v4560_v8, %v1815_v36 }
 0x1bd   : > { %v1360_v43 = vpop.f32.mrf.mxu0  ;;  %v1616_v44 = vpop.f32.mrf.mxu1 }
 0x1be   : > { %v2014_v45 = vmax.f32 %v1886_v39, 0.0  ;;  %v2078_v46 = vmax.f32 %v1950_v40, 0.0  ;;  %v1752_v47 = vmul.f32 %v4553_v3, %v1360_v43  ;;  %v1816_v48 = vmul.f32 %v4553_v3, %v1616_v44 }
 0x1bf   : > { %v1362_v49 = vpop.f32.mrf.mxu0  ;;  %v1618_v50 = vpop.f32.mrf.mxu1 }
 0x1c0   : > { %v3391_v51 = vpack.c.bf16 %v2014_v45, %v2013_v41  ;;  %v3551_v52 = vpack.c.bf16 %v2078_v46, %v2077_v42  ;;  %v1887_v53 = vadd.f32 %v4560_v8, %v1752_v47  ;;  %v1951_v54 = vadd.f32 %v4560_v8, %v1816_v48 }
 0x1c1   : > { %v1363_v56 = vpop.f32.mrf.mxu0  ;;  %v1619_v57 = vpop.f32.mrf.mxu1 }
 0x1c2   : > { %3627 = vst [vmem:[%s4352_s21 + $0xa0] sm:$0xff] %v3391_v51   ;;  %3659 = vst [vmem:[%s4352_s21 + $0x1a0] sm:$0xff] %v3551_v52   ;;  %v1753_v58 = vmul.f32 %v4553_v3, %v1363_v56  ;;  %v1817_v60 = vmul.f32 %v4553_v3, %v1619_v57  ;;  %v2015_v1 = vmax.f32 %v1887_v53, 0.0  ;;  %v2079_v2 = vmax.f32 %v1951_v54, 0.0 }
 0x1c3   : > { %v1365_v61 = vpop.f32.mrf.mxu0  ;;  %v1621_v62 = vpop.f32.mrf.mxu1 }
 0x1c4   : > { %v1888_v63 = vadd.f32 %v4560_v8, %v1753_v58  ;;  %v1952_v0 = vadd.f32 %v4560_v8, %v1817_v60 }
 0x1c5   : > { %v1368_v55 = vpop.f32.mrf.mxu0  ;;  %v1624_v4 = vpop.f32.mrf.mxu1 }
 0x1c6   : > { %v2016_v5 = vmax.f32 %v1888_v63, 0.0  ;;  %v2080_v6 = vmax.f32 %v1952_v0, 0.0  ;;  %v1754_v59 = vmul.f32 %v4553_v3, %v1368_v55  ;;  %v1818_v7 = vmul.f32 %v4553_v3, %v1624_v4 }
 0x1c7   : > { %v1370_v9 = vpop.f32.mrf.mxu0  ;;  %v1626_v10 = vpop.f32.mrf.mxu1 }
 0x1c8   : > { %v3396_v11 = vpack.c.bf16 %v2016_v5, %v2015_v1  ;;  %v3556_v12 = vpack.c.bf16 %v2080_v6, %v2079_v2  ;;  %v1889_v13 = vadd.f32 %v4560_v8, %v1754_v59  ;;  %v1953_v14 = vadd.f32 %v4560_v8, %v1818_v7 }
 0x1c9   : > { %v1371_v15 = vpop.f32.mrf.mxu0  ;;  %v1627_v16 = vpop.f32.mrf.mxu1 }
 0x1ca   : > { %3628 = vst [vmem:[%s4352_s21 + $0xa8] sm:$0xff] %v3396_v11   ;;  %3660 = vst [vmem:[%s4352_s21 + $0x1a8] sm:$0xff] %v3556_v12   ;;  %v1755_v17 = vmul.f32 %v4553_v3, %v1371_v15  ;;  %v1819_v18 = vmul.f32 %v4553_v3, %v1627_v16  ;;  %v2017_v23 = vmax.f32 %v1889_v13, 0.0  ;;  %v2081_v24 = vmax.f32 %v1953_v14, 0.0 }
 0x1cb   : > { %v1373_v19 = vpop.f32.mrf.mxu0  ;;  %v1629_v20 = vpop.f32.mrf.mxu1 }
 0x1cc   : > { %v1890_v21 = vadd.f32 %v4560_v8, %v1755_v17  ;;  %v1954_v22 = vadd.f32 %v4560_v8, %v1819_v18 }
 0x1cd   : > { %v1376_v25 = vpop.f32.mrf.mxu0  ;;  %v1632_v26 = vpop.f32.mrf.mxu1 }
 0x1ce   : > { %v2018_v27 = vmax.f32 %v1890_v21, 0.0  ;;  %v2082_v28 = vmax.f32 %v1954_v22, 0.0  ;;  %v1756_v29 = vmul.f32 %v4553_v3, %v1376_v25  ;;  %v1820_v30 = vmul.f32 %v4553_v3, %v1632_v26 }
 0x1cf   : > { %v1378_v31 = vpop.f32.mrf.mxu0  ;;  %v1634_v32 = vpop.f32.mrf.mxu1 }
 0x1d0   : > { %v3401_v33 = vpack.c.bf16 %v2018_v27, %v2017_v23  ;;  %v3561_v34 = vpack.c.bf16 %v2082_v28, %v2081_v24  ;;  %v1891_v35 = vadd.f32 %v4560_v8, %v1756_v29  ;;  %v1955_v36 = vadd.f32 %v4560_v8, %v1820_v30 }
 0x1d1   : > { %v1379_v37 = vpop.f32.mrf.mxu0  ;;  %v1635_v38 = vpop.f32.mrf.mxu1 }
 0x1d2   : > { %3629 = vst [vmem:[%s4352_s21 + $0xb0] sm:$0xff] %v3401_v33   ;;  %3661 = vst [vmem:[%s4352_s21 + $0x1b0] sm:$0xff] %v3561_v34   ;;  %v1757_v39 = vmul.f32 %v4553_v3, %v1379_v37  ;;  %v1821_v40 = vmul.f32 %v4553_v3, %v1635_v38  ;;  %v2019_v45 = vmax.f32 %v1891_v35, 0.0  ;;  %v2083_v46 = vmax.f32 %v1955_v36, 0.0 }
 0x1d3   : > { %v1381_v41 = vpop.f32.mrf.mxu0  ;;  %v1637_v42 = vpop.f32.mrf.mxu1 }
 0x1d4   : > { %v1892_v43 = vadd.f32 %v4560_v8, %v1757_v39  ;;  %v1956_v44 = vadd.f32 %v4560_v8, %v1821_v40 }
 0x1d5   : > { %v1384_v47 = vpop.f32.mrf.mxu0  ;;  %v1640_v48 = vpop.f32.mrf.mxu1 }
 0x1d6   : > { %v2020_v49 = vmax.f32 %v1892_v43, 0.0  ;;  %v2084_v50 = vmax.f32 %v1956_v44, 0.0  ;;  %v1758_v51 = vmul.f32 %v4553_v3, %v1384_v47  ;;  %v1822_v52 = vmul.f32 %v4553_v3, %v1640_v48 }
 0x1d7   : > { %v1386_v53 = vpop.f32.mrf.mxu0  ;;  %v1642_v54 = vpop.f32.mrf.mxu1 }
 0x1d8   : > { %v3406_v56 = vpack.c.bf16 %v2020_v49, %v2019_v45  ;;  %v3566_v57 = vpack.c.bf16 %v2084_v50, %v2083_v46  ;;  %v1893_v58 = vadd.f32 %v4560_v8, %v1758_v51  ;;  %v1957_v60 = vadd.f32 %v4560_v8, %v1822_v52 }
 0x1d9   : > { %v1387_v61 = vpop.f32.mrf.mxu0  ;;  %v1643_v62 = vpop.f32.mrf.mxu1 }
 0x1da   : > { %3630 = vst [vmem:[%s4352_s21 + $0xb8] sm:$0xff] %v3406_v56   ;;  %3662 = vst [vmem:[%s4352_s21 + $0x1b8] sm:$0xff] %v3566_v57   ;;  %v1759_v63 = vmul.f32 %v4553_v3, %v1387_v61  ;;  %v1823_v0 = vmul.f32 %v4553_v3, %v1643_v62  ;;  %v2021_v5 = vmax.f32 %v1893_v58, 0.0  ;;  %v2085_v6 = vmax.f32 %v1957_v60, 0.0 }
 0x1db   : > { %v1389_v1 = vpop.f32.mrf.mxu0  ;;  %v1645_v2 = vpop.f32.mrf.mxu1 }
 0x1dc   : > { %v1894_v55 = vadd.f32 %v4560_v8, %v1759_v63  ;;  %v1958_v4 = vadd.f32 %v4560_v8, %v1823_v0 }
 0x1dd   : > { %v1392_v59 = vpop.f32.mrf.mxu0  ;;  %v1648_v7 = vpop.f32.mrf.mxu1 }
 0x1de   : > { %v2022_v9 = vmax.f32 %v1894_v55, 0.0  ;;  %v2086_v10 = vmax.f32 %v1958_v4, 0.0  ;;  %v1760_v11 = vmul.f32 %v4553_v3, %v1392_v59  ;;  %v1824_v12 = vmul.f32 %v4553_v3, %v1648_v7 }
 0x1df   : > { %v1394_v13 = vpop.f32.mrf.mxu0  ;;  %v1650_v14 = vpop.f32.mrf.mxu1 }
 0x1e0   : > { %v3411_v15 = vpack.c.bf16 %v2022_v9, %v2021_v5  ;;  %v3571_v16 = vpack.c.bf16 %v2086_v10, %v2085_v6  ;;  %v1895_v17 = vadd.f32 %v4560_v8, %v1760_v11  ;;  %v1959_v18 = vadd.f32 %v4560_v8, %v1824_v12 }
 0x1e1   : > { %v1395_v19 = vpop.f32.mrf.mxu0  ;;  %v1651_v20 = vpop.f32.mrf.mxu1 }
 0x1e2   : > { %3631 = vst [vmem:[%s4352_s21 + $0xc0] sm:$0xff] %v3411_v15   ;;  %3663 = vst [vmem:[%s4352_s21 + $0x1c0] sm:$0xff] %v3571_v16   ;;  %v1761_v21 = vmul.f32 %v4553_v3, %v1395_v19  ;;  %v1825_v22 = vmul.f32 %v4553_v3, %v1651_v20  ;;  %v2023_v27 = vmax.f32 %v1895_v17, 0.0  ;;  %v2087_v28 = vmax.f32 %v1959_v18, 0.0 }
 0x1e3   : > { %v1397_v23 = vpop.f32.mrf.mxu0  ;;  %v1653_v24 = vpop.f32.mrf.mxu1 }
 0x1e4   : > { %v1896_v25 = vadd.f32 %v4560_v8, %v1761_v21  ;;  %v1960_v26 = vadd.f32 %v4560_v8, %v1825_v22 }
 0x1e5   : > { %v1400_v29 = vpop.f32.mrf.mxu0  ;;  %v1656_v30 = vpop.f32.mrf.mxu1 }
 0x1e6   : > { %v2024_v31 = vmax.f32 %v1896_v25, 0.0  ;;  %v2088_v32 = vmax.f32 %v1960_v26, 0.0  ;;  %v1762_v33 = vmul.f32 %v4553_v3, %v1400_v29  ;;  %v1826_v34 = vmul.f32 %v4553_v3, %v1656_v30 }
 0x1e7   : > { %v1402_v35 = vpop.f32.mrf.mxu0  ;;  %v1658_v36 = vpop.f32.mrf.mxu1 }
 0x1e8   : > { %v3416_v37 = vpack.c.bf16 %v2024_v31, %v2023_v27  ;;  %v3576_v38 = vpack.c.bf16 %v2088_v32, %v2087_v28  ;;  %v1897_v39 = vadd.f32 %v4560_v8, %v1762_v33  ;;  %v1961_v40 = vadd.f32 %v4560_v8, %v1826_v34 }
 0x1e9   : > { %v1403_v41 = vpop.f32.mrf.mxu0  ;;  %v1659_v42 = vpop.f32.mrf.mxu1 }
 0x1ea   : > { %3632 = vst [vmem:[%s4352_s21 + $0xc8] sm:$0xff] %v3416_v37   ;;  %3664 = vst [vmem:[%s4352_s21 + $0x1c8] sm:$0xff] %v3576_v38   ;;  %v1763_v43 = vmul.f32 %v4553_v3, %v1403_v41  ;;  %v1827_v44 = vmul.f32 %v4553_v3, %v1659_v42  ;;  %v2025_v49 = vmax.f32 %v1897_v39, 0.0  ;;  %v2089_v50 = vmax.f32 %v1961_v40, 0.0 }
 0x1eb   : > { %v1405_v45 = vpop.f32.mrf.mxu0  ;;  %v1661_v46 = vpop.f32.mrf.mxu1 }
 0x1ec   : > { %v1898_v47 = vadd.f32 %v4560_v8, %v1763_v43  ;;  %v1962_v48 = vadd.f32 %v4560_v8, %v1827_v44 }
 0x1ed   : > { %v1408_v51 = vpop.f32.mrf.mxu0  ;;  %v1664_v52 = vpop.f32.mrf.mxu1 }
 0x1ee   : > { %v2026_v53 = vmax.f32 %v1898_v47, 0.0  ;;  %v2090_v54 = vmax.f32 %v1962_v48, 0.0  ;;  %v1764_v56 = vmul.f32 %v4553_v3, %v1408_v51  ;;  %v1828_v57 = vmul.f32 %v4553_v3, %v1664_v52 }
 0x1ef   : > { %v1410_v58 = vpop.f32.mrf.mxu0  ;;  %v1666_v60 = vpop.f32.mrf.mxu1 }
 0x1f0   : > { %v3421_v61 = vpack.c.bf16 %v2026_v53, %v2025_v49  ;;  %v3581_v62 = vpack.c.bf16 %v2090_v54, %v2089_v50  ;;  %v1899_v63 = vadd.f32 %v4560_v8, %v1764_v56  ;;  %v1963_v0 = vadd.f32 %v4560_v8, %v1828_v57 }
 0x1f1   : > { %v1411_v1 = vpop.f32.mrf.mxu0  ;;  %v1667_v2 = vpop.f32.mrf.mxu1 }
 0x1f2   : > { %3633 = vst [vmem:[%s4352_s21 + $0xd0] sm:$0xff] %v3421_v61   ;;  %3665 = vst [vmem:[%s4352_s21 + $0x1d0] sm:$0xff] %v3581_v62   ;;  %v1765_v55 = vmul.f32 %v4553_v3, %v1411_v1  ;;  %v1829_v4 = vmul.f32 %v4553_v3, %v1667_v2  ;;  %v2027_v9 = vmax.f32 %v1899_v63, 0.0  ;;  %v2091_v10 = vmax.f32 %v1963_v0, 0.0 }
 0x1f3   : > { %v1413_v5 = vpop.f32.mrf.mxu0  ;;  %v1669_v6 = vpop.f32.mrf.mxu1 }
 0x1f4   : > { %v1900_v59 = vadd.f32 %v4560_v8, %v1765_v55  ;;  %v1964_v7 = vadd.f32 %v4560_v8, %v1829_v4 }
 0x1f5   : > { %v1416_v11 = vpop.f32.mrf.mxu0  ;;  %v1672_v12 = vpop.f32.mrf.mxu1 }
 0x1f6   : > { %v2028_v13 = vmax.f32 %v1900_v59, 0.0  ;;  %v2092_v14 = vmax.f32 %v1964_v7, 0.0  ;;  %v1766_v15 = vmul.f32 %v4553_v3, %v1416_v11  ;;  %v1830_v16 = vmul.f32 %v4553_v3, %v1672_v12 }
 0x1f7   : > { %v1418_v17 = vpop.f32.mrf.mxu0  ;;  %v1674_v18 = vpop.f32.mrf.mxu1 }
 0x1f8   : > { %v3426_v19 = vpack.c.bf16 %v2028_v13, %v2027_v9  ;;  %v3586_v20 = vpack.c.bf16 %v2092_v14, %v2091_v10  ;;  %v1901_v21 = vadd.f32 %v4560_v8, %v1766_v15  ;;  %v1965_v22 = vadd.f32 %v4560_v8, %v1830_v16 }
 0x1f9   : > { %v1419_v23 = vpop.f32.mrf.mxu0  ;;  %v1675_v24 = vpop.f32.mrf.mxu1 }
 0x1fa   : > { %3634 = vst [vmem:[%s4352_s21 + $0xd8] sm:$0xff] %v3426_v19   ;;  %3666 = vst [vmem:[%s4352_s21 + $0x1d8] sm:$0xff] %v3586_v20   ;;  %v1767_v25 = vmul.f32 %v4553_v3, %v1419_v23  ;;  %v1831_v26 = vmul.f32 %v4553_v3, %v1675_v24  ;;  %v2029_v31 = vmax.f32 %v1901_v21, 0.0  ;;  %v2093_v32 = vmax.f32 %v1965_v22, 0.0 }
 0x1fb   : > { %v1421_v27 = vpop.f32.mrf.mxu0  ;;  %v1677_v28 = vpop.f32.mrf.mxu1 }
 0x1fc   : > { %v1902_v29 = vadd.f32 %v4560_v8, %v1767_v25  ;;  %v1966_v30 = vadd.f32 %v4560_v8, %v1831_v26 }
 0x1fd   : > { %v1424_v33 = vpop.f32.mrf.mxu0  ;;  %v1680_v34 = vpop.f32.mrf.mxu1 }
 0x1fe   : > { %v2030_v35 = vmax.f32 %v1902_v29, 0.0  ;;  %v2094_v36 = vmax.f32 %v1966_v30, 0.0  ;;  %v1768_v37 = vmul.f32 %v4553_v3, %v1424_v33  ;;  %v1832_v38 = vmul.f32 %v4553_v3, %v1680_v34 }
 0x1ff   : > { %v1426_v39 = vpop.f32.mrf.mxu0  ;;  %v1682_v40 = vpop.f32.mrf.mxu1 }
 0x200   : > { %v3431_v41 = vpack.c.bf16 %v2030_v35, %v2029_v31  ;;  %v3591_v42 = vpack.c.bf16 %v2094_v36, %v2093_v32  ;;  %v1903_v43 = vadd.f32 %v4560_v8, %v1768_v37  ;;  %v1967_v44 = vadd.f32 %v4560_v8, %v1832_v38 }
 0x201   : > { %v1427_v45 = vpop.f32.mrf.mxu0  ;;  %v1683_v46 = vpop.f32.mrf.mxu1 }
 0x202   : > { %3635 = vst [vmem:[%s4352_s21 + $0xe0] sm:$0xff] %v3431_v41   ;;  %3667 = vst [vmem:[%s4352_s21 + $0x1e0] sm:$0xff] %v3591_v42   ;;  %v1769_v47 = vmul.f32 %v4553_v3, %v1427_v45  ;;  %v1833_v48 = vmul.f32 %v4553_v3, %v1683_v46  ;;  %v2031_v53 = vmax.f32 %v1903_v43, 0.0  ;;  %v2095_v54 = vmax.f32 %v1967_v44, 0.0 }
 0x203   : > { %v1429_v49 = vpop.f32.mrf.mxu0  ;;  %v1685_v50 = vpop.f32.mrf.mxu1 }
 0x204   : > { %v1904_v51 = vadd.f32 %v4560_v8, %v1769_v47  ;;  %v1968_v52 = vadd.f32 %v4560_v8, %v1833_v48 }
 0x205   : > { %v1432_v56 = vpop.f32.mrf.mxu0  ;;  %v1688_v57 = vpop.f32.mrf.mxu1 }
 0x206   : > { %v2032_v58 = vmax.f32 %v1904_v51, 0.0  ;;  %v2096_v60 = vmax.f32 %v1968_v52, 0.0  ;;  %v1770_v61 = vmul.f32 %v4553_v3, %v1432_v56  ;;  %v1834_v62 = vmul.f32 %v4553_v3, %v1688_v57 }
 0x207   : > { %v1434_v63 = vpop.f32.mrf.mxu0  ;;  %v1690_v0 = vpop.f32.mrf.mxu1 }
 0x208   : > { %v3436_v1 = vpack.c.bf16 %v2032_v58, %v2031_v53  ;;  %v3596_v2 = vpack.c.bf16 %v2096_v60, %v2095_v54  ;;  %v1905_v55 = vadd.f32 %v4560_v8, %v1770_v61  ;;  %v1969_v4 = vadd.f32 %v4560_v8, %v1834_v62 }
 0x209   : > { %v1435_v5 = vpop.f32.mrf.mxu0  ;;  %v1691_v6 = vpop.f32.mrf.mxu1 }
 0x20a   : > { %3636 = vst [vmem:[%s4352_s21 + $0xe8] sm:$0xff] %v3436_v1   ;;  %3668 = vst [vmem:[%s4352_s21 + $0x1e8] sm:$0xff] %v3596_v2   ;;  %v1771_v59 = vmul.f32 %v4553_v3, %v1435_v5  ;;  %v1835_v7 = vmul.f32 %v4553_v3, %v1691_v6  ;;  %v2033_v13 = vmax.f32 %v1905_v55, 0.0  ;;  %v2097_v14 = vmax.f32 %v1969_v4, 0.0 }
 0x20b   : > { %v1437_v9 = vpop.f32.mrf.mxu0  ;;  %v1693_v10 = vpop.f32.mrf.mxu1 }
 0x20c   : > { %v1906_v11 = vadd.f32 %v4560_v8, %v1771_v59  ;;  %v1970_v12 = vadd.f32 %v4560_v8, %v1835_v7 }
 0x20d   : > { %v1440_v15 = vpop.f32.mrf.mxu0  ;;  %v1696_v16 = vpop.f32.mrf.mxu1 }
 0x20e   : > { %v2034_v17 = vmax.f32 %v1906_v11, 0.0  ;;  %v2098_v18 = vmax.f32 %v1970_v12, 0.0  ;;  %v1772_v19 = vmul.f32 %v4553_v3, %v1440_v15  ;;  %v1836_v20 = vmul.f32 %v4553_v3, %v1696_v16 }
 0x20f   : > { %v1442_v21 = vpop.f32.mrf.mxu0  ;;  %v1698_v22 = vpop.f32.mrf.mxu1 }
 0x210   : > { %v3441_v23 = vpack.c.bf16 %v2034_v17, %v2033_v13  ;;  %v3601_v24 = vpack.c.bf16 %v2098_v18, %v2097_v14  ;;  %v1907_v27 = vadd.f32 %v4560_v8, %v1772_v19  ;;  %v1971_v28 = vadd.f32 %v4560_v8, %v1836_v20 }
 0x211   : > { %v1443_v25 = vpop.f32.mrf.mxu0  ;;  %v1699_v26 = vpop.f32.mrf.mxu1 }
 0x212   : > { %3637 = vst [vmem:[%s4352_s21 + $0xf0] sm:$0xff] %v3441_v23   ;;  %3669 = vst [vmem:[%s4352_s21 + $0x1f0] sm:$0xff] %v3601_v24   ;;  %v1773_v29 = vmul.f32 %v4553_v3, %v1443_v25  ;;  %v1837_v30 = vmul.f32 %v4553_v3, %v1699_v26  ;;  %v2035_v35 = vmax.f32 %v1907_v27, 0.0  ;;  %v2099_v36 = vmax.f32 %v1971_v28, 0.0 }
 0x213   : > { %v1445_v31 = vpop.f32.mrf.mxu0  ;;  %v1701_v32 = vpop.f32.mrf.mxu1 }
 0x214   : > { %v1908_v33 = vadd.f32 %v4560_v8, %v1773_v29  ;;  %v1972_v34 = vadd.f32 %v4560_v8, %v1837_v30 }
 0x216   : > { %v2036_v37 = vmax.f32 %v1908_v33, 0.0  ;;  %v2100_v38 = vmax.f32 %v1972_v34, 0.0 }
 0x218   : > { %v3446_v3 = vpack.c.bf16 %v2036_v37, %v2035_v35  ;;  %v3606_v39 = vpack.c.bf16 %v2100_v38, %v2099_v36 }
 0x21a   : > { %3638 = vst [vmem:[%s4352_s21 + $0xf8] sm:$0xff] %v3446_v3   ;;  %3670 = vst [vmem:[%s4352_s21 + $0x1f8] sm:$0xff] %v3606_v39  }
 0x21b   : > { %3984 = shalt.err (!%p3981_p5)
}
 0x21c   : > { %s3985_s13 = scalar_lea.hbm %s4695_s8, 8192  ;;  %s3989_s24 = scalar_lea.hbm %s4752_s4, 16384 }
 0x21d   : > { %p3986_p6 = scmp.ne.s32.totalorder %s4695_s8, %s3985_s13  ;;  %p3990_p10 = scmp.lt.s32.totalorder %s4695_s8, %s4752_s4 }
 0x21e   : > { %p3991_p11 = scmp.lt.s32.totalorder %s3989_s24, %s3985_s13 }
 0x21f   : > { %p3987_p7 = pnand %p3986_p6, %p4118_p4 }
 0x220   : > { %p3992_p12 = por %p3991_p11, %p3990_p10 }
 0x221   : > { %p3988_p9 = pneg %p3987_p7 }
 0x223   : > { %p3993_p13 = pnand %p3992_p12, %p3988_p9 }
 0x225   : > { %3996 = shalt.err (!%p3993_p13)
}
 0x226   : > { %s4051_s29 = smov 64   ;;  %s4052_s30 = smov 4  }
 0x227   : > { %3703 = dma.vmem_to_hbm [thread:$0]  (%p4118_p4), %s4697_s5, 8192, %s4695_s8, %s4703_s18, %s4051_s29, %s4051_s29, %s4052_s30  }
 0x228 PF: > { %p3709_p0 = scmp.ge.s32.totalorder %s4047_s20, 2  ;;  %s2771_s6 = sand.u32 1, %s4027_s15  }
 0x229   : > { %s2772_s7 = scalar_lea.sflag [#allocation3], %s2771_s6 }
 0x22a   : > { %p3706_p1 = pnand %p3709_p0, %p4125_p8 }
 0x22c   : > { %p3707_p2 = pneg %p3706_p1 }
 0x22e   : > { %4022 = dma.done.wait (%p3707_p2), %s2772_s7, 8192  }
 0x22f   : > { %4024 = vsyncadd (%p3707_p2), %s2772_s7, 4294959104  ;;  %s17_s20 = sadd.s32 1, %s4047_s20   ;;  %s4755_s15 = smov %s4031_s16 }
 0x230   : > { %p14_p3 = scmp.ge.s32.totalorder %s17_s20, 4   ;;  %s4756_s16 = smov %s4035_s17 }
 0x231   : > { %s4757_s17 = smov %s4131_s28  ;;  %s4758_s18 = smov %s4043_s19 }
 0x232   : > { %s4759_s19 = smov %s4761_s23  ;;  %16 = sbr.rel (!%p14_p3) target bundleno = 4 (0x4), region = 80 }
 0x237   :  { %2777 = vsyncpa [#allocation3], 1 }
 0x238   :  { %2779 = vsyncpa [#allocation3 + $0x1], 1 }

</bundles_post_ra>
